<compile_context>
chip_gen: v5e
topology: v5e:2x2
jax: 0.10.0
libtpu: 0.0.40
codegen_flags: <defaults>
</compile_context>

<pallas_src>
import jax
import jax.numpy as jnp
from jax.experimental import pallas as pl
from jax.experimental.pallas import tpu as pltpu


_VMEM = pl.BlockSpec(memory_space=pltpu.MemorySpace.VMEM)


def _stable_sigmoid(x):
    # Overflow-free sigmoid: exp argument is always <= 0.
    z = jnp.exp(-jnp.abs(x))
    return jnp.where(x >= 0.0, 1.0 / (1.0 + z), z / (1.0 + z))


def _fused_kernel(x_ref,
                  fw1_ref, fb1_ref, fw2_ref, fb2_ref, fw3_ref, fb3_ref,
                  cw1_ref, cb1_ref, cw2_ref, cb2_ref, cw3_ref, cb3_ref,
                  o_ref):
    B = x_ref.shape[0]
    n_ch, L, _ = cw1_ref.shape                  # (4, L, 512)

    # ---------------- feature extractor (three 1x1 convs) -----------------
    # Batch over B by concatenating the per-sample (512, L) maps along lanes
    # -> one channel-major matmul per conv layer.
    x_cat = jnp.concatenate([x_ref[b] for b in range(B)], axis=1)    # (512, B*L)
    h = jnp.dot(fw1_ref[...], x_cat.astype(jnp.bfloat16),
                preferred_element_type=jnp.float32)
    h = jnp.maximum(h + fb1_ref[...], 0.0)                           # (256, B*L)
    h = jnp.dot(fw2_ref[...], h.astype(jnp.bfloat16),
                preferred_element_type=jnp.float32)
    h = jnp.maximum(h + fb2_ref[...], 0.0)                           # (32, B*L)
    h = jnp.dot(fw3_ref[...], h.astype(jnp.bfloat16),
                preferred_element_type=jnp.float32)
    h = jnp.maximum(h + fb3_ref[...], 0.0)                           # (4, B*L)

    # ------- flatten (channel-major) fused with Linear(36, 512) -----------
    #   g[b, :] = cb1 + sum_c  h[c, b*L:(b+1)*L] @ cw1[c]
    # cw1 is pre-reshaped to (4, L, 512) so torch.flatten's c-major order is
    # absorbed into the weight; one (B, L) @ (L, 512) matmul per channel.
    g = jnp.broadcast_to(cb1_ref[...], (B, cb1_ref.shape[-1])).astype(jnp.float32)
    for c in range(n_ch):
        rows = jnp.concatenate(
            [h[c:c + 1, b * L:(b + 1) * L] for b in range(B)], axis=0)  # (B, L)
        g = g + jnp.dot(rows.astype(jnp.bfloat16), cw1_ref[c],
                        preferred_element_type=jnp.float32)
    g = jnp.maximum(g, 0.0)                                          # (B, 512)

    # --------------- remaining classifier layers, batched -----------------
    g = jnp.dot(g.astype(jnp.bfloat16), cw2_ref[...],
                preferred_element_type=jnp.float32)
    g = jnp.maximum(g + cb2_ref[...], 0.0)                           # (B, 128)
    logits = jnp.dot(g.astype(jnp.bfloat16), cw3_ref[...],
                     preferred_element_type=jnp.float32)
    logits = logits + cb3_ref[...]                                   # (B, 4)

    probs = _stable_sigmoid(logits)
    o_ref[...] = (jnp.sum(probs, axis=0, keepdims=True)
                  * (1.0 / B)).astype(o_ref.dtype)                   # batch mean


# ------------------------------- Parameters --------------------------------

def _uniform(key, shape, bound, dtype):
    # PyTorch default init: U(-1/sqrt(fan_in), 1/sqrt(fan_in)).
    return jax.random.uniform(key, shape, jnp.float32, -bound, bound).astype(dtype)


def init_params(key, L=9):
    ks = jax.random.split(key, 12)
    bnd = lambda fan_in: 1.0 / float(fan_in) ** 0.5
    feat = {
        # Conv1d weights stored as (out_ch, in_ch) (kernel=1 squeezed), bf16.
        "w1": _uniform(ks[0], (256, 512), bnd(512), jnp.bfloat16),
        "b1": _uniform(ks[1], (256, 1), bnd(512), jnp.float32),
        "w2": _uniform(ks[2], (32, 256), bnd(256), jnp.bfloat16),
        "b2": _uniform(ks[3], (32, 1), bnd(256), jnp.float32),
        "w3": _uniform(ks[4], (4, 32), bnd(32), jnp.bfloat16),
        "b3": _uniform(ks[5], (4, 1), bnd(32), jnp.float32),
    }
    clf = {
        # Linear weights stored transposed (in, out); the first one is
        # reshaped to (4, L, 512) to fuse torch.flatten's C-major order.
        "w1": _uniform(ks[6], (36, 512), bnd(36), jnp.bfloat16).reshape(4, L, 512),
        "b1": _uniform(ks[7], (1, 512), bnd(36), jnp.float32),
        "w2": _uniform(ks[8], (512, 128), bnd(512), jnp.bfloat16),
        "b2": _uniform(ks[9], (1, 128), bnd(512), jnp.float32),
        "w3": _uniform(ks[10], (128, 4), bnd(128), jnp.bfloat16),
        "b3": _uniform(ks[11], (1, 4), bnd(128), jnp.float32),
    }
    return {"feature": feat, "classifier": clf}


# ------------------------------ Forward pass --------------------------------

@jax.jit
def sum_weights_forward(x, params):
    """x: (B, 512, L) float32 in NCL layout (PyTorch Conv1d). Returns (4,)."""
    B, C, L = x.shape
    assert C == 512 and 4 * L == 36, "classifier requires 4*L == 36 (L=9)"

    f, c = params["feature"], params["classifier"]
    args = (x,
            f["w1"], f["b1"], f["w2"], f["b2"], f["w3"], f["b3"],
            c["w1"], c["b1"], c["w2"], c["b2"], c["w3"], c["b3"])

    flops = (2 * B * L * (256 * 512 + 32 * 256 + 4 * 32)
             + 2 * B * (36 * 512 + 512 * 128 + 128 * 4))
    bytes_accessed = sum(int(a.size) * a.dtype.itemsize for a in args) + 4 * 4

    out = pl.pallas_call(
        _fused_kernel,
        out_shape=jax.ShapeDtypeStruct((1, 4), jnp.float32),
        in_specs=[_VMEM] * len(args),
        out_specs=_VMEM,
        cost_estimate=pl.CostEstimate(
            flops=flops, transcendentals=4 * B,
            bytes_accessed=bytes_accessed),
    )(*args)
    return out[0]                                              # (4,)


# --------------------------- Pure-JAX reference -----------------------------

def _reference(x, params):
    f, c = params["feature"], params["classifier"]
    B, _, L = x.shape
    h = x
    for w, b in ((f["w1"], f["b1"]), (f["w2"], f["b2"]), (f["w3"], f["b3"])):
        h = jnp.einsum("oc,bcl->bol", w.astype(jnp.float32), h) + b[None]
        h = jnp.maximum(h, 0.0)
    flat = h.reshape(B, -1)                                    # channel-major
    g = jnp.maximum(flat @ c["w1"].reshape(4 * L, 512).astype(jnp.float32)
                    + c["b1"], 0.0)
    g = jnp.maximum(g @ c["w2"].astype(jnp.float32) + c["b2"], 0.0)
    logits = g @ c["w3"].astype(jnp.float32) + c["b3"]
    return jnp.mean(jax.nn.sigmoid(logits), axis=0)


# ---------------------------------- Main ------------------------------------

if __name__ == "__main__":
    key = jax.random.PRNGKey(0)
    k_param, k_x = jax.random.split(key)

    B, C, L = 2, 512, 9          # L=9 so flatten yields 4*9 = 36 features
    params = init_params(k_param, L=L)
    x = jax.random.normal(k_x, (B, C, L), dtype=jnp.float32)

    out = jax.block_until_ready(sum_weights_forward(x, params))

    assert out.shape == (4,), out.shape
    assert bool(jnp.all(jnp.isfinite(out)))
    # Loose tolerance: kernel runs bf16 matmuls with f32 accumulation.
    ref = _reference(x, params)
    assert bool(jnp.all(jnp.abs(out - ref) < 5e-2)), (out, ref)
    print("KERNEL_OK")
</pallas_src>

<mosaic_0001>
module attributes {stable_mosaic.version = 11 : i64} {
  func.func @_fused_kernel(%arg0: memref<2x512x9xf32, #tpu.memory_space<vmem>>, %arg1: memref<256x512xbf16, #tpu.memory_space<vmem>>, %arg2: memref<256x1xf32, #tpu.memory_space<vmem>>, %arg3: memref<32x256xbf16, #tpu.memory_space<vmem>>, %arg4: memref<32x1xf32, #tpu.memory_space<vmem>>, %arg5: memref<4x32xbf16, #tpu.memory_space<vmem>>, %arg6: memref<4x1xf32, #tpu.memory_space<vmem>>, %arg7: memref<4x9x512xbf16, #tpu.memory_space<vmem>>, %arg8: memref<1x512xf32, #tpu.memory_space<vmem>>, %arg9: memref<512x128xbf16, #tpu.memory_space<vmem>>, %arg10: memref<1x128xf32, #tpu.memory_space<vmem>>, %arg11: memref<128x4xbf16, #tpu.memory_space<vmem>>, %arg12: memref<1x4xf32, #tpu.memory_space<vmem>>, %arg13: memref<1x4xf32, #tpu.memory_space<vmem>>) attributes {dimension_semantics = [], scalar_prefetch = 0 : i64, scratch_operands = 0 : i64, tpu.core_type = #tpu.core_type<tc>} {
    %c0 = arith.constant 0 : index
    %c0_0 = arith.constant 0 : index
    %c0_1 = arith.constant 0 : index
    %0 = vector.load %arg0[%c0, %c0_0, %c0_1] : memref<2x512x9xf32, #tpu.memory_space<vmem>>, vector<1x512x9xf32>
    %1 = vector.shape_cast %0 : vector<1x512x9xf32> to vector<512x9xf32>
    %c1 = arith.constant 1 : index
    %c0_2 = arith.constant 0 : index
    %c0_3 = arith.constant 0 : index
    %2 = vector.load %arg0[%c1, %c0_2, %c0_3] : memref<2x512x9xf32, #tpu.memory_space<vmem>>, vector<1x512x9xf32>
    %3 = vector.shape_cast %2 : vector<1x512x9xf32> to vector<512x9xf32>
    %4 = tpu.concatenate %1, %3 in 1 : vector<512x9xf32>, vector<512x9xf32> -> vector<512x18xf32>
    %c0_4 = arith.constant 0 : index
    %c0_5 = arith.constant 0 : index
    %5 = vector.load %arg1[%c0_4, %c0_5] : memref<256x512xbf16, #tpu.memory_space<vmem>>, vector<256x512xbf16>
    %6 = arith.truncf %4 : vector<512x18xf32> to vector<512x18xbf16>
    %cst = arith.constant dense<0.000000e+00> : vector<256x18xf32>
    %7 = tpu.matmul %5, %6, %cst {dimension_numbers = #tpu.dot_dimension_numbers<[1], [0], [0], [1], [0, 0, 1, 1], [], []>} : vector<256x512xbf16>, vector<512x18xbf16>, vector<256x18xf32> -> vector<256x18xf32>
    %c0_6 = arith.constant 0 : index
    %c0_7 = arith.constant 0 : index
    %8 = vector.load %arg2[%c0_6, %c0_7] : memref<256x1xf32, #tpu.memory_space<vmem>>, vector<256x1xf32>
    %9 = vector.broadcast %8 : vector<256x1xf32> to vector<256x18xf32>
    %10 = arith.addf %7, %9 : vector<256x18xf32>
    %cst_8 = arith.constant 0.000000e+00 : f32
    %11 = vector.broadcast %cst_8 : f32 to vector<256x18xf32>
    %12 = arith.maximumf %10, %11 : vector<256x18xf32>
    %c0_9 = arith.constant 0 : index
    %c0_10 = arith.constant 0 : index
    %13 = vector.load %arg3[%c0_9, %c0_10] : memref<32x256xbf16, #tpu.memory_space<vmem>>, vector<32x256xbf16>
    %14 = arith.truncf %12 : vector<256x18xf32> to vector<256x18xbf16>
    %cst_11 = arith.constant dense<0.000000e+00> : vector<32x18xf32>
    %15 = tpu.matmul %13, %14, %cst_11 {dimension_numbers = #tpu.dot_dimension_numbers<[1], [0], [0], [1], [0, 0, 1, 1], [], []>} : vector<32x256xbf16>, vector<256x18xbf16>, vector<32x18xf32> -> vector<32x18xf32>
    %c0_12 = arith.constant 0 : index
    %c0_13 = arith.constant 0 : index
    %16 = vector.load %arg4[%c0_12, %c0_13] : memref<32x1xf32, #tpu.memory_space<vmem>>, vector<32x1xf32>
    %17 = vector.broadcast %16 : vector<32x1xf32> to vector<32x18xf32>
    %18 = arith.addf %15, %17 : vector<32x18xf32>
    %cst_14 = arith.constant 0.000000e+00 : f32
    %19 = vector.broadcast %cst_14 : f32 to vector<32x18xf32>
    %20 = arith.maximumf %18, %19 : vector<32x18xf32>
    %c0_15 = arith.constant 0 : index
    %c0_16 = arith.constant 0 : index
    %21 = vector.load %arg5[%c0_15, %c0_16] : memref<4x32xbf16, #tpu.memory_space<vmem>>, vector<4x32xbf16>
    %22 = arith.truncf %20 : vector<32x18xf32> to vector<32x18xbf16>
    %cst_17 = arith.constant dense<0.000000e+00> : vector<4x18xf32>
    %23 = tpu.matmul %21, %22, %cst_17 {dimension_numbers = #tpu.dot_dimension_numbers<[1], [0], [0], [1], [0, 0, 1, 1], [], []>} : vector<4x32xbf16>, vector<32x18xbf16>, vector<4x18xf32> -> vector<4x18xf32>
    %c0_18 = arith.constant 0 : index
    %c0_19 = arith.constant 0 : index
    %24 = vector.load %arg6[%c0_18, %c0_19] : memref<4x1xf32, #tpu.memory_space<vmem>>, vector<4x1xf32>
    %25 = vector.broadcast %24 : vector<4x1xf32> to vector<4x18xf32>
    %26 = arith.addf %23, %25 : vector<4x18xf32>
    %cst_20 = arith.constant 0.000000e+00 : f32
    %27 = vector.broadcast %cst_20 : f32 to vector<4x18xf32>
    %28 = arith.maximumf %26, %27 : vector<4x18xf32>
    %c0_21 = arith.constant 0 : index
    %c0_22 = arith.constant 0 : index
    %29 = vector.load %arg8[%c0_21, %c0_22] : memref<1x512xf32, #tpu.memory_space<vmem>>, vector<1x512xf32>
    %30 = vector.shape_cast %29 : vector<1x512xf32> to vector<1x512xf32>
    %31 = vector.broadcast %30 : vector<1x512xf32> to vector<2x512xf32>
    %32 = vector.extract_strided_slice %28 {offsets = [0, 0], sizes = [1, 9], strides = [1, 1]} : vector<4x18xf32> to vector<1x9xf32>
    %33 = vector.extract_strided_slice %28 {offsets = [0, 9], sizes = [1, 9], strides = [1, 1]} : vector<4x18xf32> to vector<1x9xf32>
    %34 = tpu.concatenate %32, %33 in 0 : vector<1x9xf32>, vector<1x9xf32> -> vector<2x9xf32>
    %35 = arith.truncf %34 : vector<2x9xf32> to vector<2x9xbf16>
    %c0_23 = arith.constant 0 : index
    %c0_24 = arith.constant 0 : index
    %c0_25 = arith.constant 0 : index
    %36 = vector.load %arg7[%c0_23, %c0_24, %c0_25] : memref<4x9x512xbf16, #tpu.memory_space<vmem>>, vector<1x9x512xbf16>
    %37 = vector.shape_cast %36 : vector<1x9x512xbf16> to vector<9x512xbf16>
    %cst_26 = arith.constant dense<0.000000e+00> : vector<2x512xf32>
    %38 = tpu.matmul %35, %37, %cst_26 {dimension_numbers = #tpu.dot_dimension_numbers<[1], [0], [0], [1], [0, 0, 1, 1], [], []>} : vector<2x9xbf16>, vector<9x512xbf16>, vector<2x512xf32> -> vector<2x512xf32>
    %39 = arith.addf %31, %38 : vector<2x512xf32>
    %40 = vector.extract_strided_slice %28 {offsets = [1, 0], sizes = [1, 9], strides = [1, 1]} : vector<4x18xf32> to vector<1x9xf32>
    %41 = vector.extract_strided_slice %28 {offsets = [1, 9], sizes = [1, 9], strides = [1, 1]} : vector<4x18xf32> to vector<1x9xf32>
    %42 = tpu.concatenate %40, %41 in 0 : vector<1x9xf32>, vector<1x9xf32> -> vector<2x9xf32>
    %43 = arith.truncf %42 : vector<2x9xf32> to vector<2x9xbf16>
    %c1_27 = arith.constant 1 : index
    %c0_28 = arith.constant 0 : index
    %c0_29 = arith.constant 0 : index
    %44 = vector.load %arg7[%c1_27, %c0_28, %c0_29] : memref<4x9x512xbf16, #tpu.memory_space<vmem>>, vector<1x9x512xbf16>
    %45 = vector.shape_cast %44 : vector<1x9x512xbf16> to vector<9x512xbf16>
    %cst_30 = arith.constant dense<0.000000e+00> : vector<2x512xf32>
    %46 = tpu.matmul %43, %45, %cst_30 {dimension_numbers = #tpu.dot_dimension_numbers<[1], [0], [0], [1], [0, 0, 1, 1], [], []>} : vector<2x9xbf16>, vector<9x512xbf16>, vector<2x512xf32> -> vector<2x512xf32>
    %47 = arith.addf %39, %46 : vector<2x512xf32>
    %48 = vector.extract_strided_slice %28 {offsets = [2, 0], sizes = [1, 9], strides = [1, 1]} : vector<4x18xf32> to vector<1x9xf32>
    %49 = vector.extract_strided_slice %28 {offsets = [2, 9], sizes = [1, 9], strides = [1, 1]} : vector<4x18xf32> to vector<1x9xf32>
    %50 = tpu.concatenate %48, %49 in 0 : vector<1x9xf32>, vector<1x9xf32> -> vector<2x9xf32>
    %51 = arith.truncf %50 : vector<2x9xf32> to vector<2x9xbf16>
    %c2 = arith.constant 2 : index
    %c0_31 = arith.constant 0 : index
    %c0_32 = arith.constant 0 : index
    %52 = vector.load %arg7[%c2, %c0_31, %c0_32] : memref<4x9x512xbf16, #tpu.memory_space<vmem>>, vector<1x9x512xbf16>
    %53 = vector.shape_cast %52 : vector<1x9x512xbf16> to vector<9x512xbf16>
    %cst_33 = arith.constant dense<0.000000e+00> : vector<2x512xf32>
    %54 = tpu.matmul %51, %53, %cst_33 {dimension_numbers = #tpu.dot_dimension_numbers<[1], [0], [0], [1], [0, 0, 1, 1], [], []>} : vector<2x9xbf16>, vector<9x512xbf16>, vector<2x512xf32> -> vector<2x512xf32>
    %55 = arith.addf %47, %54 : vector<2x512xf32>
    %56 = vector.extract_strided_slice %28 {offsets = [3, 0], sizes = [1, 9], strides = [1, 1]} : vector<4x18xf32> to vector<1x9xf32>
    %57 = vector.extract_strided_slice %28 {offsets = [3, 9], sizes = [1, 9], strides = [1, 1]} : vector<4x18xf32> to vector<1x9xf32>
    %58 = tpu.concatenate %56, %57 in 0 : vector<1x9xf32>, vector<1x9xf32> -> vector<2x9xf32>
    %59 = arith.truncf %58 : vector<2x9xf32> to vector<2x9xbf16>
    %c3 = arith.constant 3 : index
    %c0_34 = arith.constant 0 : index
    %c0_35 = arith.constant 0 : index
    %60 = vector.load %arg7[%c3, %c0_34, %c0_35] : memref<4x9x512xbf16, #tpu.memory_space<vmem>>, vector<1x9x512xbf16>
    %61 = vector.shape_cast %60 : vector<1x9x512xbf16> to vector<9x512xbf16>
    %cst_36 = arith.constant dense<0.000000e+00> : vector<2x512xf32>
    %62 = tpu.matmul %59, %61, %cst_36 {dimension_numbers = #tpu.dot_dimension_numbers<[1], [0], [0], [1], [0, 0, 1, 1], [], []>} : vector<2x9xbf16>, vector<9x512xbf16>, vector<2x512xf32> -> vector<2x512xf32>
    %63 = arith.addf %55, %62 : vector<2x512xf32>
    %cst_37 = arith.constant 0.000000e+00 : f32
    %64 = vector.broadcast %cst_37 : f32 to vector<2x512xf32>
    %65 = arith.maximumf %63, %64 : vector<2x512xf32>
    %66 = arith.truncf %65 : vector<2x512xf32> to vector<2x512xbf16>
    %c0_38 = arith.constant 0 : index
    %c0_39 = arith.constant 0 : index
    %67 = vector.load %arg9[%c0_38, %c0_39] : memref<512x128xbf16, #tpu.memory_space<vmem>>, vector<512x128xbf16>
    %cst_40 = arith.constant dense<0.000000e+00> : vector<2x128xf32>
    %68 = tpu.matmul %66, %67, %cst_40 {dimension_numbers = #tpu.dot_dimension_numbers<[1], [0], [0], [1], [0, 0, 1, 1], [], []>} : vector<2x512xbf16>, vector<512x128xbf16>, vector<2x128xf32> -> vector<2x128xf32>
    %c0_41 = arith.constant 0 : index
    %c0_42 = arith.constant 0 : index
    %69 = vector.load %arg10[%c0_41, %c0_42] : memref<1x128xf32, #tpu.memory_space<vmem>>, vector<1x128xf32>
    %70 = vector.broadcast %69 : vector<1x128xf32> to vector<2x128xf32>
    %71 = arith.addf %68, %70 : vector<2x128xf32>
    %cst_43 = arith.constant 0.000000e+00 : f32
    %72 = vector.broadcast %cst_43 : f32 to vector<2x128xf32>
    %73 = arith.maximumf %71, %72 : vector<2x128xf32>
    %74 = arith.truncf %73 : vector<2x128xf32> to vector<2x128xbf16>
    %c0_44 = arith.constant 0 : index
    %c0_45 = arith.constant 0 : index
    %75 = vector.load %arg11[%c0_44, %c0_45] : memref<128x4xbf16, #tpu.memory_space<vmem>>, vector<128x4xbf16>
    %cst_46 = arith.constant dense<0.000000e+00> : vector<2x4xf32>
    %76 = tpu.matmul %74, %75, %cst_46 {dimension_numbers = #tpu.dot_dimension_numbers<[1], [0], [0], [1], [0, 0, 1, 1], [], []>} : vector<2x128xbf16>, vector<128x4xbf16>, vector<2x4xf32> -> vector<2x4xf32>
    %c0_47 = arith.constant 0 : index
    %c0_48 = arith.constant 0 : index
    %77 = vector.load %arg12[%c0_47, %c0_48] : memref<1x4xf32, #tpu.memory_space<vmem>>, vector<1x4xf32>
    %78 = vector.broadcast %77 : vector<1x4xf32> to vector<2x4xf32>
    %79 = arith.addf %76, %78 : vector<2x4xf32>
    %80 = math.absf %79 : vector<2x4xf32>
    %cst_49 = arith.constant 0.000000e+00 : f32
    %81 = vector.broadcast %cst_49 : f32 to vector<2x4xf32>
    %82 = arith.subf %81, %80 : vector<2x4xf32>
    %83 = math.exp %82 : vector<2x4xf32>
    %cst_50 = arith.constant 0.000000e+00 : f32
    %84 = vector.broadcast %cst_50 : f32 to vector<2x4xf32>
    %85 = arith.cmpf oge, %79, %84 : vector<2x4xf32>
    %cst_51 = arith.constant 1.000000e+00 : f32
    %86 = vector.broadcast %cst_51 : f32 to vector<2x4xf32>
    %87 = arith.addf %86, %83 : vector<2x4xf32>
    %cst_52 = arith.constant 1.000000e+00 : f32
    %88 = vector.broadcast %cst_52 : f32 to vector<2x4xf32>
    %89 = arith.divf %88, %87 : vector<2x4xf32>
    %cst_53 = arith.constant 1.000000e+00 : f32
    %90 = vector.broadcast %cst_53 : f32 to vector<2x4xf32>
    %91 = arith.addf %90, %83 : vector<2x4xf32>
    %92 = arith.divf %83, %91 : vector<2x4xf32>
    %93 = arith.select %85, %89, %92 : vector<2x4xi1>, vector<2x4xf32>
    %cst_54 = arith.constant dense<0.000000e+00> : vector<4xf32>
    %94 = vector.multi_reduction <add>, %93, %cst_54 [0] : vector<2x4xf32> to vector<4xf32>
    %95 = vector.shape_cast %94 : vector<4xf32> to vector<1x4xf32>
    %cst_55 = arith.constant 5.000000e-01 : f32
    %96 = vector.broadcast %cst_55 : f32 to vector<1x4xf32>
    %97 = arith.mulf %95, %96 : vector<1x4xf32>
    %c0_56 = arith.constant 0 : index
    %c0_57 = arith.constant 0 : index
    %98 = vector.load %arg13[%c0_56, %c0_57] : memref<1x4xf32, #tpu.memory_space<vmem>>, vector<1x4xf32>
    tpu.vector_store %arg13[%c0_56, %c0_57], %97 {strides = array<i32>} : memref<1x4xf32, #tpu.memory_space<vmem>>, vector<1x4xf32>,
    return
  }
}

</mosaic_0001>

<bundles_post_ra>
// kernel: sum_weights_forward.1
= control target key start
LH: loop header
LB: loop body
LE: loop exit
PB: predicated region body
PF: predicated region fallthrough
CT: control target
= control target key end

     0   :  { %s3409_s16 = smov 9   ;;  %s4943_s0 = inlined_call_operand.vmem [shape: f32[2,512,9], index: 0, kind: input, shape index: {}]   ;;  %s4944_s1 = inlined_call_operand.vmem [shape: bf16[256,512], index: 1, kind: input, shape index: {}]   ;;  %s4945_s2 = inlined_call_operand.vmem [shape: f32[256,1], index: 2, kind: input, shape index: {}]   ;;  %s4946_s3 = inlined_call_operand.vmem [shape: bf16[32,256], index: 3, kind: input, shape index: {}]   ;;  %s4947_s4 = inlined_call_operand.vmem [shape: f32[32,1], index: 4, kind: input, shape index: {}]   ;;  %s4948_s5 = inlined_call_operand.vmem [shape: bf16[4,32], index: 5, kind: input, shape index: {}]   ;;  %s4949_s6 = inlined_call_operand.vmem [shape: f32[4,1], index: 6, kind: input, shape index: {}]   ;;  %s4950_s7 = inlined_call_operand.vmem [shape: bf16[4,9,512], index: 7, kind: input, shape index: {}]   ;;  %s4951_s8 = inlined_call_operand.vmem [shape: f32[1,512], index: 8, kind: input, shape index: {}]   ;;  %s4952_s9 = inlined_call_operand.vmem [shape: bf16[512,128], index: 9, kind: input, shape index: {}]   ;;  %s4953_s10 = inlined_call_operand.vmem [shape: f32[1,128], index: 10, kind: input, shape index: {}]   ;;  %s4954_s11 = inlined_call_operand.vmem [shape: bf16[128,4], index: 11, kind: input, shape index: {}]   ;;  %s4955_s12 = inlined_call_operand.vmem [shape: f32[1,4], index: 12, kind: input, shape index: {}]   ;;  %s4956_s13 = inlined_call_operand.hbm [shape: f32[1,4], index: 13, kind: output, shape index: {}]  }
   0x1   :  { %v2550_v0 = vld [vmem:[%s4943_s0 + $0x3f0] sm:$0xff]  ;;  %v2551_v1 = vld [vmem:[%s4943_s0 + $0x3f8] sm:$0xff]  ;;  %v2532_v8 = vld [vmem:[%s4943_s0 + $0x360] sm:$0xff] }
   0x2   :  { %v2534_v2 = vld [vmem:[%s4943_s0 + $0x370] sm:$0xff]  ;;  %v3224_v3 = vpack.i.bf16 %v2551_v1, %v2550_v0  ;;  %v2535_v4 = vld [vmem:[%s4943_s0 + $0x378] sm:$0xff]  ;;  %v2533_v9 = vld [vmem:[%s4943_s0 + $0x368] sm:$0xff] }
   0x3   :  { %v3214_v5 = vpack.i.bf16 %v2535_v4, %v2534_v2  ;;  %v2518_v6 = vld [vmem:[%s4943_s0 + $0x2f0] sm:$0xff]  ;;  %v2519_v7 = vld [vmem:[%s4943_s0 + $0x2f8] sm:$0xff]  ;;  %v3234_v12 = vpack.i.bf16 %v2533_v9, %v2532_v8  ;;  %v2500_v15 = vld [vmem:[%s4943_s0 + $0x260] sm:$0xff] }
   0x4   :  { %3225 = vrot.lane.b32.xlu1 %v3224_v3, %s3409_s16  ;;  %v2502_v10 = vld [vmem:[%s4943_s0 + $0x270] sm:$0xff]  ;;  %v2503_v11 = vld [vmem:[%s4943_s0 + $0x278] sm:$0xff]  ;;  %v3229_v13 = vpack.i.bf16 %v2519_v7, %v2518_v6  ;;  %v2501_v16 = vld [vmem:[%s4943_s0 + $0x268] sm:$0xff] }
   0x5   :  { %3215 = vrot.lane.b32.xlu0 %v3214_v5, %s3409_s16  ;;  %3235 = vrot.lane.b32.xlu2 %v3234_v12, %s3409_s16  ;;  %v3219_v14 = vpack.i.bf16 %v2503_v11, %v2502_v10 }
   0x6   :  { %18 = vsyncpa [#allocation3], 0  ;;  %v3239_v17 = vpack.i.bf16 %v2501_v16, %v2500_v15  ;;  %v2516_v18 = vld [vmem:[%s4943_s0 + $0x2e0] sm:$0xff]  ;;  %v2517_v19 = vld [vmem:[%s4943_s0 + $0x2e8] sm:$0xff]  ;;  %vm431_vm0 = vcmask 72704   ;;  %vm1607_vm1 = vcmask 261120  }
   0x7   :  { %v2548_v20 = vld [vmem:[%s4943_s0 + $0x3e0] sm:$0xff]  ;;  %v2549_v21 = vld [vmem:[%s4943_s0 + $0x3e8] sm:$0xff]  ;;  %v3249_v22 = vpack.i.bf16 %v2517_v19, %v2516_v18  ;;  %v2530_v24 = vld [vmem:[%s4943_s0 + $0x350] sm:$0xff]  ;;  %vm1666_vm2 = vcmask 1043456   ;;  %vm1667_vm3 = vcmask 1044480   ;;  %vm1640_vm4 = vcmask 1040384  }
   0x8   :  { %v3244_v23 = vpack.i.bf16 %v2549_v21, %v2548_v20  ;;  %v2531_v25 = vld [vmem:[%s4943_s0 + $0x358] sm:$0xff]  ;;  %v2546_v27 = vld [vmem:[%s4943_s0 + $0x3d0] sm:$0xff]  ;;  %v2496_v36 = vld [vmem:[%s4943_s0 + $0x240] sm:$0xff]  ;;  %vm2461_vm9 = vcmask 25600   ;;  %vm2470_vm11 = vcmask 24576  }
   0x9   :  { %v3254_v26 = vpack.i.bf16 %v2531_v25, %v2530_v24  ;;  %v2547_v28 = vld [vmem:[%s4943_s0 + $0x3d8] sm:$0xff]  ;;  %v2498_v29 = vld [vmem:[%s4943_s0 + $0x250] sm:$0xff]  ;;  %v2497_v37 = vld [vmem:[%s4943_s0 + $0x248] sm:$0xff] }
   0xa   :  { %v2499_v30 = vld [vmem:[%s4943_s0 + $0x258] sm:$0xff]  ;;  %v3264_v31 = vpack.i.bf16 %v2547_v28, %v2546_v27  ;;  %v2514_v33 = vld [vmem:[%s4943_s0 + $0x2d0] sm:$0xff]  ;;  %v2528_v38 = vld [vmem:[%s4943_s0 + $0x340] sm:$0xff]  ;;  %v3279_v40 = vpack.i.bf16 %v2497_v37, %v2496_v36 }
   0xb   :  { %v3259_v32 = vpack.i.bf16 %v2499_v30, %v2498_v29  ;;  %v2515_v34 = vld [vmem:[%s4943_s0 + $0x2d8] sm:$0xff]  ;;  %v2529_v39 = vld [vmem:[%s4943_s0 + $0x348] sm:$0xff]  ;;  %v2544_v42 = vld [vmem:[%s4943_s0 + $0x3c0] sm:$0xff] }
   0xc   :  { %3230 = vrot.lane.b32.xlu1 %v3229_v13, %s3409_s16  ;;  %v3269_v35 = vpack.i.bf16 %v2515_v34, %v2514_v33  ;;  %v3274_v41 = vpack.i.bf16 %v2529_v39, %v2528_v38  ;;  %v2545_v43 = vld [vmem:[%s4943_s0 + $0x3c8] sm:$0xff]  ;;  %v2526_v45 = vld [vmem:[%s4943_s0 + $0x330] sm:$0xff]  ;;  %v2527_v46 = vld [vmem:[%s4943_s0 + $0x338] sm:$0xff] }
   0xd   :  { %3220 = vrot.lane.b32.xlu0 %v3219_v14, %s3409_s16  ;;  %3240 = vrot.lane.b32.xlu2 %v3239_v17, %s3409_s16  ;;  %v3284_v44 = vpack.i.bf16 %v2545_v43, %v2544_v42  ;;  %v2512_v47 = vld [vmem:[%s4943_s0 + $0x2c0] sm:$0xff]  ;;  %v2513_v48 = vld [vmem:[%s4943_s0 + $0x2c8] sm:$0xff]  ;;  %v3294_v49 = vpack.i.bf16 %v2527_v46, %v2526_v45 }
   0xe   :  { %v3289_v50 = vpack.i.bf16 %v2513_v48, %v2512_v47  ;;  %v2494_v51 = vld [vmem:[%s4943_s0 + $0x230] sm:$0xff]  ;;  %v2495_v52 = vld [vmem:[%s4943_s0 + $0x238] sm:$0xff]  ;;  %v2524_v60 = vld [vmem:[%s4943_s0 + $0x320] sm:$0xff] }
   0xf   :  { %v3299_v53 = vpack.i.bf16 %v2495_v52, %v2494_v51  ;;  %v2510_v54 = vld [vmem:[%s4943_s0 + $0x2b0] sm:$0xff]  ;;  %v2511_v55 = vld [vmem:[%s4943_s0 + $0x2b8] sm:$0xff]  ;;  %v2525_v61 = vld [vmem:[%s4943_s0 + $0x328] sm:$0xff] }
  0x10   :  { %v2542_v56 = vld [vmem:[%s4943_s0 + $0x3b0] sm:$0xff]  ;;  %v2543_v57 = vld [vmem:[%s4943_s0 + $0x3b8] sm:$0xff]  ;;  %v3309_v58 = vpack.i.bf16 %v2511_v55, %v2510_v54  ;;  %v3314_v62 = vpack.i.bf16 %v2525_v61, %v2524_v60  ;;  %v2540_v63 = vld [vmem:[%s4943_s0 + $0x3a0] sm:$0xff] }
  0x11   :  { %v3304_v59 = vpack.i.bf16 %v2543_v57, %v2542_v56  ;;  %v2541_v0 = vld [vmem:[%s4943_s0 + $0x3a8] sm:$0xff]  ;;  %v2492_v1 = vld [vmem:[%s4943_s0 + $0x220] sm:$0xff]  ;;  %v2490_v8 = vld [vmem:[%s4943_s0 + $0x210] sm:$0xff] }
  0x12   :  { %v2493_v2 = vld [vmem:[%s4943_s0 + $0x228] sm:$0xff]  ;;  %v3324_v3 = vpack.i.bf16 %v2541_v0, %v2540_v63  ;;  %v2508_v5 = vld [vmem:[%s4943_s0 + $0x2a0] sm:$0xff]  ;;  %v2491_v9 = vld [vmem:[%s4943_s0 + $0x218] sm:$0xff] }
  0x13   :  { %v3319_v4 = vpack.i.bf16 %v2493_v2, %v2492_v1  ;;  %v2509_v6 = vld [vmem:[%s4943_s0 + $0x2a8] sm:$0xff]  ;;  %v2522_v10 = vld [vmem:[%s4943_s0 + $0x310] sm:$0xff]  ;;  %v2523_v11 = vld [vmem:[%s4943_s0 + $0x318] sm:$0xff]  ;;  %v3339_v12 = vpack.i.bf16 %v2491_v9, %v2490_v8 }
  0x14   :  { %3250 = vrot.lane.b32.xlu1 %v3249_v22, %s3409_s16  ;;  %v3329_v7 = vpack.i.bf16 %v2509_v6, %v2508_v5  ;;  %v3334_v13 = vpack.i.bf16 %v2523_v11, %v2522_v10  ;;  %v2538_v14 = vld [vmem:[%s4943_s0 + $0x390] sm:$0xff]  ;;  %v2539_v15 = vld [vmem:[%s4943_s0 + $0x398] sm:$0xff]  ;;  %v2520_v17 = vld [vmem:[%s4943_s0 + $0x300] sm:$0xff] }
  0x15   :  { %3245 = vrot.lane.b32.xlu0 %v3244_v23, %s3409_s16  ;;  %3255 = vrot.lane.b32.xlu2 %v3254_v26, %s3409_s16  ;;  %v3344_v16 = vpack.i.bf16 %v2539_v15, %v2538_v14  ;;  %v2521_v18 = vld [vmem:[%s4943_s0 + $0x308] sm:$0xff]  ;;  %v2506_v19 = vld [vmem:[%s4943_s0 + $0x290] sm:$0xff] }
  0x16   :  { %v2507_v20 = vld [vmem:[%s4943_s0 + $0x298] sm:$0xff]  ;;  %v3354_v21 = vpack.i.bf16 %v2521_v18, %v2520_v17  ;;  %v2488_v23 = vld [vmem:[%s4943_s0 + $0x200] sm:$0xff]  ;;  %v2489_v24 = vld [vmem:[%s4943_s0 + $0x208] sm:$0xff] }
  0x17   :  { %v3349_v22 = vpack.i.bf16 %v2507_v20, %v2506_v19  ;;  %v3359_v25 = vpack.i.bf16 %v2489_v24, %v2488_v23  ;;  %v2504_v26 = vld [vmem:[%s4943_s0 + $0x280] sm:$0xff]  ;;  %v2505_v27 = vld [vmem:[%s4943_s0 + $0x288] sm:$0xff]  ;;  %v108_v39 = vld [vmem:[%s4943_s0 + $0x1f0] sm:$0xff] }
  0x18   :  { %v2536_v28 = vld [vmem:[%s4943_s0 + $0x380] sm:$0xff]  ;;  %v2537_v29 = vld [vmem:[%s4943_s0 + $0x388] sm:$0xff]  ;;  %v3369_v30 = vpack.i.bf16 %v2505_v27, %v2504_v26  ;;  %v92_v45 = vld [vmem:[%s4943_s0 + $0x170] sm:$0xff] }
  0x19   :  { %v90_v37 = vld [vmem:[%s4943_s0 + $0x160] sm:$0xff]  ;;  %v93_v46 = vld [vmem:[%s4943_s0 + $0x178] sm:$0xff]  ;;  %v88_v61 = vld [vmem:[%s4943_s0 + $0x150] sm:$0xff] }
  0x1a   :  { %v58_v0 = vld [vmem:[%s4943_s0 + $0x60] sm:$0xff]  ;;  %v59_v2 = vld [vmem:[%s4943_s0 + $0x68] sm:$0xff]  ;;  %v77_v5 = vld [vmem:[%s4943_s0 + $0xf8] sm:$0xff] }
  0x1b   :  { %v60_v11 = vld [vmem:[%s4943_s0 + $0x70] sm:$0xff]  ;;  %v604_v17 = vld [vmem:[%s4945_s2 + $0x60] sm:$0xff] }
  0x1c   :  { %3265 = vrot.lane.b32.xlu1 %v3264_v31, %s3409_s16  ;;  %v3364_v31 = vpack.i.bf16 %v2537_v29, %v2536_v28 }
  0x1d   :  { %3260 = vrot.lane.b32.xlu0 %v3259_v32, %s3409_s16  ;;  %3270 = vrot.lane.b32.xlu2 %v3269_v35, %s3409_s16 }
  0x24   :  { %3280 = vrot.lane.b32.xlu1 %v3279_v40, %s3409_s16  ;;  %v109_v40 = vld [vmem:[%s4943_s0 + $0x1f8] sm:$0xff] }
  0x25   :  { %3275 = vrot.lane.b32.xlu0 %v3274_v41, %s3409_s16  ;;  %3285 = vrot.lane.b32.xlu2 %v3284_v44, %s3409_s16  ;;  %v91_v41 = vld [vmem:[%s4943_s0 + $0x168] sm:$0xff] }
  0x2c   :  { %3295 = vrot.lane.b32.xlu1 %v3294_v49, %s3409_s16 }
  0x2d   :  { %3290 = vrot.lane.b32.xlu0 %v3289_v50, %s3409_s16  ;;  %3300 = vrot.lane.b32.xlu2 %v3299_v53, %s3409_s16 }
  0x34   :  { %3310 = vrot.lane.b32.xlu1 %v3309_v58, %s3409_s16 }
  0x35   :  { %3305 = vrot.lane.b32.xlu0 %v3304_v59, %s3409_s16  ;;  %3315 = vrot.lane.b32.xlu2 %v3314_v62, %s3409_s16  ;;  %v89_v62 = vld [vmem:[%s4943_s0 + $0x158] sm:$0xff] }
  0x3c   :  { %3325 = vrot.lane.b32.xlu1 %v3324_v3, %s3409_s16 }
  0x3d   :  { %3320 = vrot.lane.b32.xlu0 %v3319_v4, %s3409_s16  ;;  %3330 = vrot.lane.b32.xlu2 %v3329_v7, %s3409_s16  ;;  %v76_v4 = vld [vmem:[%s4943_s0 + $0xf0] sm:$0xff] }
  0x44   :  { %3340 = vrot.lane.b32.xlu1 %v3339_v12, %s3409_s16  ;;  %v61_v12 = vld [vmem:[%s4943_s0 + $0x78] sm:$0xff] }
  0x45   :  { %3335 = vrot.lane.b32.xlu0 %v3334_v13, %s3409_s16  ;;  %3345 = vrot.lane.b32.xlu2 %v3344_v16, %s3409_s16 }
  0x4c   :  { %3355 = vrot.lane.b32.xlu1 %v3354_v21, %s3409_s16  ;;  %v3410_v21 = vmov 0  }
  0x4d   :  { %3350 = vrot.lane.b32.xlu0 %v3349_v22, %s3409_s16  ;;  %3360 = vrot.lane.b32.xlu2 %v3359_v25, %s3409_s16 }
  0x4e   :  { %3376 = vset.pattern.permute.xlu1 %v3410_v21  ;;  %3374 = vset.pattern.permute.xlu2 %v3410_v21 }
  0x4f   :  { %3375 = vset.pattern.permute.xlu0 %v3410_v21  ;;  %v53_v21 = vld [vmem:[%s4943_s0 + $0x38] sm:$0xff] }
  0x54   :  { %3370 = vrot.lane.b32.xlu1 %v3369_v30, %s3409_s16  ;;  %v74_v30 = vld [vmem:[%s4943_s0 + $0xe0] sm:$0xff] }
  0x55   :  { %3365 = vrot.lane.b32.xlu0 %v3364_v31, %s3409_s16 }
  0x5c   :  { %686 = vperm.xlu1 %3376, %v604_v17   ;;  %v54_v17 = vld [vmem:[%s4943_s0 + $0x40] sm:$0xff] }
  0x5f   :  { %v3236_v32 = vpop.permute.xlu2 %3235 }
  0x60   :  { %v3237_v35 = vunpack.i.l.bf16 %v3236_v32  ;;  %v3238_v36 = vunpack.i.h.bf16 %v3236_v32  ;;  %v75_v32 = vld [vmem:[%s4943_s0 + $0xe8] sm:$0xff] }
  0x62   :  { %v476_v49 = vsel %vm431_vm0, %v90_v37, %v3237_v35  ;;  %v477_v53 = vsel %vm431_vm0, %v91_v41, %v3238_v36 }
  0x63   :  { %v582_v1 = vpack.c.bf16 %v477_v53, %v476_v49 }
  0x67   :  { %v3241_v33 = vpop.permute.xlu2 %3240 }
  0x68   :  { %v3242_v59 = vunpack.i.l.bf16 %v3241_v33  ;;  %v3243_v63 = vunpack.i.h.bf16 %v3241_v33  ;;  %v72_v33 = vld [vmem:[%s4943_s0 + $0xd0] sm:$0xff] }
  0x6a   :  { %v444_v13 = vsel %vm431_vm0, %v58_v0, %v3242_v59  ;;  %v445_v16 = vsel %vm431_vm0, %v59_v2, %v3243_v63  ;;  %v103_v59 = vld [vmem:[%s4943_s0 + $0x1c8] sm:$0xff]  ;;  %v56_v63 = vld [vmem:[%s4943_s0 + $0x50] sm:$0xff]  ;;  %v57_v0 = vld [vmem:[%s4943_s0 + $0x58] sm:$0xff] }
  0x6b   :  { %v566_v29 = vpack.c.bf16 %v445_v16, %v444_v13 }
  0x6f   :  { %v3256_v34 = vpop.permute.xlu2 %3255 }
  0x70   :  { %v3258_v52 = vunpack.i.h.bf16 %v3256_v34  ;;  %v3257_v57 = vunpack.i.l.bf16 %v3256_v34  ;;  %v73_v34 = vld [vmem:[%s4943_s0 + $0xd8] sm:$0xff] }
  0x72   :  { %v474_v6 = vsel %vm431_vm0, %v88_v61, %v3257_v57  ;;  %v475_v7 = vsel %vm431_vm0, %v89_v62, %v3258_v52  ;;  %v105_v57 = vld [vmem:[%s4943_s0 + $0x1d8] sm:$0xff] }
  0x73   :  { %v581_v20 = vpack.c.bf16 %v475_v7, %v474_v6 }
  0x76   :  { %v3226_v38 = vpop.permute.xlu1 %3225 }
  0x77   :  { %v3228_v42 = vunpack.i.h.bf16 %v3226_v38  ;;  %v3227_v43 = vunpack.i.l.bf16 %v3226_v38  ;;  %v3216_v44 = vpop.permute.xlu0 %3215  ;;  %v3732_v58 = vpop.permute.xlu2 %3270  ;;  %v106_v38 = vld [vmem:[%s4943_s0 + $0x1e0] sm:$0xff] }
  0x78   :  { %v3218_v47 = vunpack.i.h.bf16 %v3216_v44  ;;  %v3217_v48 = vunpack.i.l.bf16 %v3216_v44  ;;  %v3273_v27 = vunpack.i.h.bf16 %v3732_v58  ;;  %v3272_v28 = vunpack.i.l.bf16 %v3732_v58  ;;  %v102_v58 = vld [vmem:[%s4943_s0 + $0x1c0] sm:$0xff] }
  0x79   :  { %v494_v50 = vsel %vm431_vm0, %v108_v39, %v3227_v43  ;;  %v495_v51 = vsel %vm431_vm0, %v109_v40, %v3228_v42  ;;  %v107_v39 = vld [vmem:[%s4943_s0 + $0x1e8] sm:$0xff]  ;;  %v602_v42 = vld [vmem:[%s4945_s2 + $0x50] sm:$0xff] }
  0x7a   :  { %v478_v54 = vsel %vm431_vm0, %v92_v45, %v3217_v48  ;;  %v479_v55 = vsel %vm431_vm0, %v93_v46, %v3218_v47  ;;  %v591_v56 = vpack.c.bf16 %v495_v51, %v494_v50  ;;  %v458_v45 = vsel %vm431_vm0, %v72_v33, %v3272_v28  ;;  %676 = vperm.xlu1 %3376, %v602_v42  }
  0x7b   :  { %v583_v60 = vpack.c.bf16 %v479_v55, %v478_v54  ;;  %v459_v46 = vsel %vm431_vm0, %v73_v34, %v3273_v27  ;;  %v104_v55 = vld [vmem:[%s4943_s0 + $0x1d0] sm:$0xff] }
  0x7c   :  { %1371 = vmatpush.bf16.msra.mxu3 %v591_v56  ;;  %v573_v52 = vpack.c.bf16 %v459_v46, %v458_v45  ;;  %v84_v45 = vld [vmem:[%s4943_s0 + $0x130] sm:$0xff]  ;;  %v85_v46 = vld [vmem:[%s4943_s0 + $0x138] sm:$0xff] }
  0x7d   :  { %1282 = vmatpush.bf16.msra.mxu2 %v583_v60 }
  0x7e   :  { %v3231_v3 = vpop.permute.xlu1 %3230 }
  0x7f   :  { %v3233_v8 = vunpack.i.h.bf16 %v3231_v3  ;;  %v3232_v9 = vunpack.i.l.bf16 %v3231_v3  ;;  %v3221_v10 = vpop.permute.xlu0 %3220  ;;  %v3286_v25 = vpop.permute.xlu2 %3285  ;;  %v601_v3 = vld [vmem:[%s4945_s2 + $0x48] sm:$0xff] }
  0x80   :  { %v3223_v14 = vunpack.i.h.bf16 %v3221_v10  ;;  %v3222_v15 = vunpack.i.l.bf16 %v3221_v10  ;;  %v3288_v53 = vunpack.i.h.bf16 %v3286_v25  ;;  %v3287_v54 = vunpack.i.l.bf16 %v3286_v25  ;;  %v86_v25 = vld [vmem:[%s4943_s0 + $0x140] sm:$0xff] }
  0x81   :  { %1283 = vmatpush.bf16.msra.mxu2 %v582_v1  ;;  %v462_v18 = vsel %vm431_vm0, %v76_v4, %v3232_v9  ;;  %v463_v19 = vsel %vm431_vm0, %v77_v5, %v3233_v8  ;;  %v606_v4 = vld [vmem:[%s4945_s2 + $0x70] sm:$0xff] }
  0x82   :  { %v446_v22 = vsel %vm431_vm0, %v60_v11, %v3222_v15  ;;  %v447_v23 = vsel %vm431_vm0, %v61_v12, %v3223_v14  ;;  %v575_v24 = vpack.c.bf16 %v463_v19, %v462_v18  ;;  %v488_v7 = vsel %vm431_vm0, %v102_v58, %v3287_v54  ;;  %696 = vperm.xlu2 %3374, %v606_v4   ;;  %v55_v19 = vld [vmem:[%s4943_s0 + $0x48] sm:$0xff]  ;;  %v603_v58 = vld [vmem:[%s4945_s2 + $0x58] sm:$0xff] }
  0x83   :  { %v567_v26 = vpack.c.bf16 %v447_v23, %v446_v22  ;;  %v489_v8 = vsel %vm431_vm0, %v103_v59, %v3288_v53  ;;  %671 = vperm.xlu1 %3376, %v601_v3  }
  0x84   :  { %1193 = vmatpush.bf16.msra.mxu1 %v575_v24  ;;  %v588_v14 = vpack.c.bf16 %v489_v8, %v488_v7  ;;  %v68_v7 = vld [vmem:[%s4943_s0 + $0xb0] sm:$0xff]  ;;  %v69_v8 = vld [vmem:[%s4943_s0 + $0xb8] sm:$0xff] }
  0x85   :  { %1104 = vmatpush.bf16.msra.mxu0 %v567_v26  ;;  %1284 = vmatpush.bf16.msra.mxu2 %v581_v20  ;;  %v52_v20 = vld [vmem:[%s4943_s0 + $0x30] sm:$0xff]  ;;  %v87_v26 = vld [vmem:[%s4943_s0 + $0x148] sm:$0xff] }
  0x86   :  { %v3251_v31 = vpop.permute.xlu1 %3250 }
  0x87   :  { %v3253_v35 = vunpack.i.h.bf16 %v3251_v31  ;;  %v3252_v36 = vunpack.i.l.bf16 %v3251_v31  ;;  %v3246_v37 = vpop.permute.xlu0 %3245  ;;  %v3301_v50 = vpop.permute.xlu2 %3300 }
  0x88   :  { %v3248_v40 = vunpack.i.h.bf16 %v3246_v37  ;;  %v3247_v41 = vunpack.i.l.bf16 %v3246_v37  ;;  %v3303_v15 = vunpack.i.h.bf16 %v3301_v50  ;;  %v3302_v16 = vunpack.i.l.bf16 %v3301_v50 }
  0x89   :  { %1105 = vmatpush.bf16.msra.mxu0 %v566_v29  ;;  %v460_v43 = vsel %vm431_vm0, %v74_v30, %v3252_v36  ;;  %v461_v44 = vsel %vm431_vm0, %v75_v32, %v3253_v35  ;;  %v598_v29 = vld [vmem:[%s4945_s2 + $0x30] sm:$0xff]  ;;  %v605_v30 = vld [vmem:[%s4945_s2 + $0x68] sm:$0xff] }
  0x8a   :  { %v492_v47 = vsel %vm431_vm0, %v106_v38, %v3247_v41  ;;  %v493_v48 = vsel %vm431_vm0, %v107_v39, %v3248_v40  ;;  %v574_v49 = vpack.c.bf16 %v461_v44, %v460_v43  ;;  %v438_v33 = vsel %vm431_vm0, %v52_v20, %v3302_v16  ;;  %691 = vperm.xlu2 %3374, %v605_v30   ;;  %v82_v43 = vld [vmem:[%s4943_s0 + $0x120] sm:$0xff]  ;;  %v618_v20 = vld [vmem:[%s4945_s2 + $0xd0] sm:$0xff] }
  0x8b   :  { %v590_v51 = vpack.c.bf16 %v493_v48, %v492_v47  ;;  %v439_v34 = vsel %vm431_vm0, %v53_v21, %v3303_v15  ;;  %656 = vperm.xlu1 %3376, %v598_v29   ;;  %v83_v47 = vld [vmem:[%s4943_s0 + $0x128] sm:$0xff]  ;;  %v622_v21 = vld [vmem:[%s4945_s2 + $0xf0] sm:$0xff] }
  0x8c   :  { %1194 = vmatpush.bf16.msra.mxu1 %v574_v49  ;;  %v563_v40 = vpack.c.bf16 %v439_v34, %v438_v33  ;;  %v98_v34 = vld [vmem:[%s4943_s0 + $0x1a0] sm:$0xff] }
  0x8d   :  { %1372 = vmatpush.bf16.msra.mxu3 %v590_v51  ;;  %v70_v51 = vld [vmem:[%s4943_s0 + $0xc0] sm:$0xff] }
  0x8e   :  { %v3266_v56 = vpop.permute.xlu1 %3265 }
  0x8f   :  { %v3268_v60 = vunpack.i.h.bf16 %v3266_v56  ;;  %v3267_v61 = vunpack.i.l.bf16 %v3266_v56  ;;  %v3261_v62 = vpop.permute.xlu0 %3260  ;;  %v3316_v13 = vpop.permute.xlu2 %3315  ;;  %v607_v56 = vld [vmem:[%s4945_s2 + $0x78] sm:$0xff] }
  0x90   :  { %v3263_v1 = vunpack.i.h.bf16 %v3261_v62  ;;  %v3262_v2 = vunpack.i.l.bf16 %v3261_v62  ;;  %1195 = vmatpush.bf16.msra.mxu1 %v573_v52  ;;  %v3317_v39 = vunpack.i.l.bf16 %v3316_v13  ;;  %v3318_v41 = vunpack.i.h.bf16 %v3316_v13  ;;  %v71_v52 = vld [vmem:[%s4943_s0 + $0xc8] sm:$0xff]  ;;  %701 = vperm.xlu0 %3375, %v607_v56   ;;  %v100_v13 = vld [vmem:[%s4943_s0 + $0x1b0] sm:$0xff] }
  0x91   :  { %v490_v5 = vsel %vm431_vm0, %v104_v55, %v3267_v61  ;;  %v491_v6 = vsel %vm431_vm0, %v105_v57, %v3268_v60  ;;  %v621_v57 = vld [vmem:[%s4945_s2 + $0xe8] sm:$0xff] }
  0x92   :  { %v442_v9 = vsel %vm431_vm0, %v56_v63, %v3262_v2  ;;  %v443_v10 = vsel %vm431_vm0, %v57_v0, %v3263_v1  ;;  %v589_v11 = vpack.c.bf16 %v491_v6, %v490_v5  ;;  %v468_v55 = vsel %vm431_vm0, %v82_v43, %v3317_v39  ;;  %681 = vperm.xlu2 %3374, %v603_v58   ;;  %v66_v5 = vld [vmem:[%s4943_s0 + $0xa0] sm:$0xff] }
  0x93   :  { %v565_v12 = vpack.c.bf16 %v443_v10, %v442_v9  ;;  %v469_v61 = vsel %vm431_vm0, %v83_v47, %v3318_v41  ;;  %771 = vperm.xlu1 %3376, %v621_v57   ;;  %v67_v9 = vld [vmem:[%s4943_s0 + $0xa8] sm:$0xff]  ;;  %v599_v47 = vld [vmem:[%s4945_s2 + $0x38] sm:$0xff] }
  0x94   :  { %1373 = vmatpush.bf16.msra.mxu3 %v589_v11  ;;  %v578_v3 = vpack.c.bf16 %v469_v61, %v468_v55  ;;  %v51_v41 = vld [vmem:[%s4943_s0 + $0x28] sm:$0xff]  ;;  %v46_v61 = vld [vmem:[%s4943_s0] sm:$0xff] }
  0x95   :  { %1106 = vmatpush.bf16.msra.mxu0 %v565_v12 }
  0x96   :  { %v3281_v18 = vpop.permute.xlu1 %3280 }
  0x97   :  { %v3276_v22 = vpop.permute.xlu0 %3275  ;;  %v3283_v23 = vunpack.i.h.bf16 %v3281_v18  ;;  %v3282_v24 = vunpack.i.l.bf16 %v3281_v18  ;;  %v3331_v42 = vpop.permute.xlu2 %3330 }
  0x98   :  { %v3278_v27 = vunpack.i.h.bf16 %v3276_v22  ;;  %v3277_v28 = vunpack.i.l.bf16 %v3276_v22  ;;  %1374 = vmatpush.bf16.msra.mxu3 %v588_v14  ;;  %v3332_v2 = vunpack.i.l.bf16 %v3331_v42  ;;  %v3333_v4 = vunpack.i.h.bf16 %v3331_v42  ;;  %v101_v14 = vld [vmem:[%s4943_s0 + $0x1b8] sm:$0xff] }
  0x99   :  { %v440_v31 = vsel %vm431_vm0, %v54_v17, %v3282_v24  ;;  %v441_v32 = vsel %vm431_vm0, %v55_v19, %v3283_v23  ;;  %v600_v19 = vld [vmem:[%s4945_s2 + $0x40] sm:$0xff] }
  0x9a   :  { %v472_v35 = vsel %vm431_vm0, %v86_v25, %v3277_v28  ;;  %v473_v36 = vsel %vm431_vm0, %v87_v26, %v3278_v27  ;;  %v564_v37 = vpack.c.bf16 %v441_v32, %v440_v31  ;;  %v452_v18 = vsel %vm431_vm0, %v66_v5, %v3332_v2  ;;  %666 = vperm.xlu0 %3375, %v600_v19   ;;  %v96_v32 = vld [vmem:[%s4943_s0 + $0x190] sm:$0xff]  ;;  %v620_v5 = vld [vmem:[%s4945_s2 + $0xe0] sm:$0xff] }
  0x9b   :  { %v580_v38 = vpack.c.bf16 %v473_v36, %v472_v35  ;;  %v453_v24 = vsel %vm431_vm0, %v67_v9, %v3333_v4  ;;  %776 = vperm.xlu2 %3374, %v622_v21   ;;  %756 = vperm.xlu1 %3376, %v618_v20   ;;  %v99_v35 = vld [vmem:[%s4943_s0 + $0x1a8] sm:$0xff]  ;;  %v97_v36 = vld [vmem:[%s4943_s0 + $0x198] sm:$0xff]  ;;  %v2554_v19 = vld [vmem:[%s4944_s1] sm:$0xf] }
  0x9c   :  { %1107 = vmatpush.bf16.msra.mxu0 %v564_v37  ;;  %v570_v30 = vpack.c.bf16 %v453_v24, %v452_v18  ;;  %v3079_v20 = vld [vmem:[%s4944_s1 + $0xc] sm:$0xf0] }
  0x9d   :  { %1285 = vmatpush.bf16.msra.mxu2 %v580_v38 }
  0x9e   :  { %v3296_v44 = vpop.permute.xlu1 %3295 }
  0x9f   :  { %v3291_v48 = vpop.permute.xlu0 %3290  ;;  %v3298_v49 = vunpack.i.h.bf16 %v3296_v44  ;;  %v3297_v50 = vunpack.i.l.bf16 %v3296_v44  ;;  %v3346_v15 = vpop.permute.xlu2 %3345 }
  0xa0   :  { %v3293_v53 = vunpack.i.h.bf16 %v3291_v48  ;;  %v3292_v54 = vunpack.i.l.bf16 %v3291_v48  ;;  %1108 = vmatpush.bf16.msra.mxu0 %v563_v40  ;;  %v3347_v29 = vunpack.i.l.bf16 %v3346_v15  ;;  %v3348_v31 = vunpack.i.h.bf16 %v3346_v15  ;;  %v50_v40 = vld [vmem:[%s4943_s0 + $0x20] sm:$0xff] }
  0xa1   :  { %v470_v59 = vsel %vm431_vm0, %v84_v45, %v3297_v50  ;;  %v471_v60 = vsel %vm431_vm0, %v85_v46, %v3298_v49  ;;  %v623_v45 = vld [vmem:[%s4945_s2 + $0xf8] sm:$0xff] }
  0xa2   :  { %v456_v62 = vsel %vm431_vm0, %v70_v51, %v3292_v54  ;;  %v457_v63 = vsel %vm431_vm0, %v71_v52, %v3293_v53  ;;  %v579_v0 = vpack.c.bf16 %v471_v60, %v470_v59  ;;  %v482_v44 = vsel %vm431_vm0, %v96_v32, %v3347_v29  ;;  %v595_v46 = vld [vmem:[%s4945_s2 + $0x18] sm:$0xff]  ;;  %781 = vperm.xlu0 %3375, %v623_v45   ;;  %v48_v59 = vld [vmem:[%s4943_s0 + $0x10] sm:$0xff]  ;;  %v63_v45 = vld [vmem:[%s4943_s0 + $0x88] sm:$0xff] }
  0xa3   :  { %v572_v1 = vpack.c.bf16 %v457_v63, %v456_v62  ;;  %v483_v51 = vsel %vm431_vm0, %v97_v36, %v3348_v31  ;;  %661 = vperm.xlu2 %3374, %v599_v47   ;;  %641 = vperm.xlu1 %3376, %v595_v46   ;;  %v49_v60 = vld [vmem:[%s4943_s0 + $0x18] sm:$0xff]  ;;  %v80_v63 = vld [vmem:[%s4943_s0 + $0x110] sm:$0xff]  ;;  %v94_v46 = vld [vmem:[%s4943_s0 + $0x180] sm:$0xff] }
  0xa4   :  { %1286 = vmatpush.bf16.msra.mxu2 %v579_v0  ;;  %v585_v57 = vpack.c.bf16 %v483_v51, %v482_v44  ;;  %v81_v0 = vld [vmem:[%s4943_s0 + $0x118] sm:$0xff]  ;;  %v62_v44 = vld [vmem:[%s4943_s0 + $0x80] sm:$0xff]  ;;  %v594_v51 = vld [vmem:[%s4945_s2 + $0x10] sm:$0xff] }
  0xa5   :  { %1196 = vmatpush.bf16.msra.mxu1 %v572_v1  ;;  %v47_v1 = vld [vmem:[%s4943_s0 + $0x8] sm:$0xff]  ;;  %v65_v29 = vld [vmem:[%s4943_s0 + $0x98] sm:$0xff] }
  0xa6   :  { %v3311_v6 = vpop.permute.xlu1 %3310 }
  0xa7   :  { %v3306_v10 = vpop.permute.xlu0 %3305  ;;  %v3313_v11 = vunpack.i.h.bf16 %v3311_v6  ;;  %v3312_v12 = vunpack.i.l.bf16 %v3311_v6  ;;  %v3361_v50 = vpop.permute.xlu2 %3360  ;;  %v592_v6 = vld [vmem:[%s4945_s2] sm:$0xff] }
  0xa8   :  { %v3308_v16 = vunpack.i.h.bf16 %v3306_v10  ;;  %v3307_v17 = vunpack.i.l.bf16 %v3306_v10  ;;  %1287 = vmatpush.bf16.msra.mxu2 %v578_v3  ;;  %v3362_v56 = vunpack.i.l.bf16 %v3361_v50  ;;  %v3363_v58 = vunpack.i.h.bf16 %v3361_v50  ;;  %v95_v50 = vld [vmem:[%s4943_s0 + $0x188] sm:$0xff] }
  0xa9   :  { %v454_v22 = vsel %vm431_vm0, %v68_v7, %v3312_v12  ;;  %v455_v23 = vsel %vm431_vm0, %v69_v8, %v3313_v11  ;;  %v596_v7 = vld [vmem:[%s4945_s2 + $0x20] sm:$0xff] }
  0xaa   :  { %v486_v25 = vsel %vm431_vm0, %v100_v13, %v3307_v17  ;;  %v487_v26 = vsel %vm431_vm0, %v101_v14, %v3308_v16  ;;  %v571_v27 = vpack.c.bf16 %v455_v23, %v454_v22  ;;  %v432_v10 = vsel %vm431_vm0, %v46_v61, %v3362_v56  ;;  %766 = vperm.xlu0 %3375, %v620_v5   ;;  %v78_v22 = vld [vmem:[%s4943_s0 + $0x100] sm:$0xff]  ;;  %v79_v23 = vld [vmem:[%s4943_s0 + $0x108] sm:$0xff]  ;;  %v2556_v56 = vld [vmem:[%s4944_s1 + $0x10] sm:$0xf0] }
  0xab   :  { %v587_v28 = vpack.c.bf16 %v487_v26, %v486_v25  ;;  %v433_v13 = vsel %vm431_vm0, %v47_v1, %v3363_v58  ;;  %646 = vperm.xlu2 %3374, %v596_v7   ;;  %626 = vperm.xlu1 %3376, %v592_v6   ;;  %v2578_v6 = vld [vmem:[%s4944_s1 + $0x28] sm:$0xf]  ;;  %v3084_v7 = vld [vmem:[%s4944_s1 + $0x34] sm:$0xf0] }
  0xac   :  { %1197 = vmatpush.bf16.msra.mxu1 %v571_v27  ;;  %v560_v18 = vpack.c.bf16 %v433_v13, %v432_v10  ;;  %v2555_v27 = vor.u32 %v3079_v20, %v2554_v19  ;;  %v3081_v10 = vld [vmem:[%s4944_s1 + $0x24] sm:$0xf]  ;;  %v2580_v13 = vld [vmem:[%s4944_s1 + $0x38] sm:$0xf0]  ;;  %v2594_v19 = vld [vmem:[%s4944_s1 + $0x48] sm:$0xf] }
  0xad   :  { %1375 = vmatpush.bf16.msra.mxu3 %v587_v28  ;;  %v64_v28 = vld [vmem:[%s4943_s0 + $0x90] sm:$0xff]  ;;  %v3088_v20 = vld [vmem:[%s4944_s1 + $0x54] sm:$0xf0] }
  0xae   :  { %v3326_v33 = vpop.permute.xlu1 %3325 }
  0xaf   :  { %v3328_v37 = vunpack.i.h.bf16 %v3326_v33  ;;  %v3327_v38 = vunpack.i.l.bf16 %v3326_v33  ;;  %v3321_v39 = vpop.permute.xlu0 %3320  ;;  %v3080_v33 = vld [vmem:[%s4944_s1 + $0x14] sm:$0xf0] }
  0xb0   :  { %v3323_v42 = vunpack.i.h.bf16 %v3321_v39  ;;  %v3322_v43 = vunpack.i.l.bf16 %v3321_v39  ;;  %1198 = vmatpush.bf16.msra.mxu1 %v570_v30  ;;  %v2562_v30 = vld [vmem:[%s4944_s1 + $0x8] sm:$0xf] }
  0xb1   :  { %v484_v48 = vsel %vm431_vm0, %v98_v34, %v3327_v38  ;;  %v485_v49 = vsel %vm431_vm0, %v99_v35, %v3328_v37  ;;  %v597_v34 = vld [vmem:[%s4945_s2 + $0x28] sm:$0xff]  ;;  %v619_v35 = vld [vmem:[%s4945_s2 + $0xd8] sm:$0xff] }
  0xb2   :  { %v436_v52 = vsel %vm431_vm0, %v50_v40, %v3322_v43  ;;  %v437_v53 = vsel %vm431_vm0, %v51_v41, %v3323_v42  ;;  %v586_v54 = vpack.c.bf16 %v485_v49, %v484_v48  ;;  %651 = vperm.xlu0 %3375, %v597_v34   ;;  %v2563_v42 = vor.u32 %v3080_v33, %v2562_v30  ;;  %v3089_v34 = vld [vmem:[%s4944_s1 + $0x64] sm:$0xf] }
  0xb3   :  { %v562_v55 = vpack.c.bf16 %v437_v53, %v436_v52  ;;  %761 = vperm.xlu2 %3374, %v619_v35   ;;  %v616_v52 = vld [vmem:[%s4945_s2 + $0xc0] sm:$0xff]  ;;  %v2604_v35 = vld [vmem:[%s4944_s1 + $0x70] sm:$0xf0] }
  0xb4   :  { %1376 = vmatpush.bf16.msra.mxu3 %v586_v54 }
  0xb5   :  { %1109 = vmatpush.bf16.msra.mxu0 %v562_v55  ;;  %v3077_v55 = vld [vmem:[%s4944_s1 + $0x4] sm:$0xf] }
  0xb6   :  { %v3341_v62 = vpop.permute.xlu1 %3340  ;;  %v2559_v1 = vor.u32 %v3077_v55, %v2556_v56  ;;  %v2634_v56 = vld [vmem:[%s4944_s1 + $0xa0] sm:$0xf] }
  0xb7   :  { %v3336_v2 = vpop.permute.xlu0 %3335  ;;  %v3343_v3 = vunpack.i.h.bf16 %v3341_v62  ;;  %v3342_v4 = vunpack.i.l.bf16 %v3341_v62 }
  0xb8   :  { %v3338_v8 = vunpack.i.h.bf16 %v3336_v2  ;;  %v3337_v9 = vunpack.i.l.bf16 %v3336_v2  ;;  %1377 = vmatpush.bf16.msra.mxu3 %v585_v57 }
  0xb9   :  { %v434_v11 = vsel %vm431_vm0, %v48_v59, %v3342_v4  ;;  %v435_v12 = vsel %vm431_vm0, %v49_v60, %v3343_v3  ;;  %v3078_v59 = vld [vmem:[%s4944_s1 + $0xc] sm:$0xf]  ;;  %v2564_v60 = vld [vmem:[%s4944_s1 + $0x18] sm:$0xf0]  ;;  %v2570_v3 = vld [vmem:[%s4944_s1 + $0x20] sm:$0xf] }
  0xba   :  { %v561_v14 = vpack.c.bf16 %v435_v12, %v434_v11  ;;  %v466_v15 = vsel %vm431_vm0, %v80_v63, %v3337_v9  ;;  %v467_v16 = vsel %vm431_vm0, %v81_v0, %v3338_v8  ;;  %636 = vperm.xlu0 %3375, %v594_v51   ;;  %v2567_v2 = vor.u32 %v3078_v59, %v2564_v60  ;;  %v3083_v4 = vld [vmem:[%s4944_s1 + $0x2c] sm:$0xf0]  ;;  %v593_v8 = vld [vmem:[%s4945_s2 + $0x8] sm:$0xff]  ;;  %v2572_v11 = vld [vmem:[%s4944_s1 + $0x30] sm:$0xf0] }
  0xbb   :  { %v577_v17 = vpack.c.bf16 %v467_v16, %v466_v15  ;;  %746 = vperm.xlu2 %3374, %v616_v52   ;;  %v2571_v5 = vor.u32 %v3083_v4, %v2570_v3  ;;  %v2579_v9 = vor.u32 %v3084_v7, %v2578_v6  ;;  %v3082_v12 = vld [vmem:[%s4944_s1 + $0x2c] sm:$0xf]  ;;  %v2586_v16 = vld [vmem:[%s4944_s1 + $0x40] sm:$0xf]  ;;  %v2628_v51 = vld [vmem:[%s4944_s1 + $0x98] sm:$0xf0] }
  0xbc   :  { %1110 = vmatpush.bf16.msra.mxu0 %v561_v14  ;;  %v2575_v14 = vor.u32 %v3081_v10, %v2572_v11  ;;  %v2583_v15 = vor.u32 %v3082_v12, %v2580_v13  ;;  %v2642_v59 = vld [vmem:[%s4944_s1 + $0xa8] sm:$0xf]  ;;  %v3100_v60 = vld [vmem:[%s4944_s1 + $0xb4] sm:$0xf0]  ;;  %v2644_v3 = vld [vmem:[%s4944_s1 + $0xb8] sm:$0xf0] }
  0xbd   :  { %1288 = vmatpush.bf16.msra.mxu2 %v577_v17  ;;  %v3087_v17 = vld [vmem:[%s4944_s1 + $0x4c] sm:$0xf0]  ;;  %v2650_v6 = vld [vmem:[%s4944_s1 + $0xc0] sm:$0xf]  ;;  %v2658_v11 = vld [vmem:[%s4944_s1 + $0xc8] sm:$0xf] }
  0xbe   :  { %v3356_v21 = vpop.permute.xlu1 %3355  ;;  %v3103_v7 = vld [vmem:[%s4944_s1 + $0xcc] sm:$0xf0]  ;;  %v3104_v12 = vld [vmem:[%s4944_s1 + $0xd4] sm:$0xf0]  ;;  %v617_v13 = vld [vmem:[%s4945_s2 + $0xc8] sm:$0xff] }
  0xbf   :  { %v3351_v24 = vpop.permute.xlu0 %3350  ;;  %v3358_v25 = vunpack.i.h.bf16 %v3356_v21  ;;  %v3357_v26 = vunpack.i.l.bf16 %v3356_v21  ;;  %v2595_v21 = vor.u32 %v3088_v20, %v2594_v19  ;;  %v2651_v10 = vor.u32 %v3103_v7, %v2650_v6  ;;  %v614_v20 = vld [vmem:[%s4945_s2 + $0xb0] sm:$0xff] }
  0xc0   :  { %v3353_v31 = vunpack.i.h.bf16 %v3351_v24  ;;  %v3352_v32 = vunpack.i.l.bf16 %v3351_v24  ;;  %1111 = vmatpush.bf16.msra.mxu0 %v560_v18  ;;  %v2587_v18 = vor.u32 %v3087_v17, %v2586_v16  ;;  %v3086_v24 = vld [vmem:[%s4944_s1 + $0x4c] sm:$0xf]  ;;  %v3101_v16 = vld [vmem:[%s4944_s1 + $0xc4] sm:$0xf] }
  0xc1   :  { %v464_v36 = vsel %vm431_vm0, %v78_v22, %v3357_v26  ;;  %v465_v37 = vsel %vm431_vm0, %v79_v23, %v3358_v25  ;;  %v3085_v22 = vld [vmem:[%s4944_s1 + $0x44] sm:$0xf]  ;;  %v2588_v23 = vld [vmem:[%s4944_s1 + $0x50] sm:$0xf0]  ;;  %v2596_v25 = vld [vmem:[%s4944_s1 + $0x58] sm:$0xf0] }
  0xc2   :  { %v450_v38 = vsel %vm431_vm0, %v64_v28, %v3352_v32  ;;  %v451_v39 = vsel %vm431_vm0, %v65_v29, %v3353_v31  ;;  %v576_v40 = vpack.c.bf16 %v465_v37, %v464_v36  ;;  %v2591_v26 = vor.u32 %v3085_v22, %v2588_v23  ;;  %v2602_v28 = vld [vmem:[%s4944_s1 + $0x60] sm:$0xf]  ;;  %v3091_v29 = vld [vmem:[%s4944_s1 + $0x6c] sm:$0xf0]  ;;  %v2610_v31 = vld [vmem:[%s4944_s1 + $0x68] sm:$0xf]  ;;  %751 = vperm.xlu0 %3375, %v617_v13  }
  0xc3   :  { %1112 = vmatmul.bf16.vlgmr.msra.gmra.mxu0 %v2555_v27  ;;  %v569_v41 = vpack.c.bf16 %v451_v39, %v450_v38  ;;  %631 = vperm.xlu2 %3374, %v593_v8   ;;  %v2599_v27 = vor.u32 %v3086_v24, %v2596_v25  ;;  %v2603_v30 = vor.u32 %v3091_v29, %v2602_v28  ;;  %v3092_v32 = vld [vmem:[%s4944_s1 + $0x74] sm:$0xf0]  ;;  %v3090_v36 = vld [vmem:[%s4944_s1 + $0x6c] sm:$0xf]  ;;  %v2612_v37 = vld [vmem:[%s4944_s1 + $0x78] sm:$0xf0] }
  0xc4   :  { %1289 = vmatpush.bf16.msra.mxu2 %v576_v40  ;;  %v2611_v33 = vor.u32 %v3092_v32, %v2610_v31  ;;  %v2607_v38 = vor.u32 %v3089_v34, %v2604_v35  ;;  %v2615_v39 = vor.u32 %v3090_v36, %v2612_v37  ;;  %v2618_v40 = vld [vmem:[%s4944_s1 + $0x80] sm:$0xf]  ;;  %v3102_v22 = vld [vmem:[%s4944_s1 + $0xcc] sm:$0xf]  ;;  %v2660_v23 = vld [vmem:[%s4944_s1 + $0xd8] sm:$0xf0] }
  0xc5   :  { %1199 = vmatpush.bf16.msra.mxu1 %v569_v41  ;;  %v3095_v41 = vld [vmem:[%s4944_s1 + $0x8c] sm:$0xf0]  ;;  %v2663_v25 = vor.u32 %v3102_v22, %v2660_v23  ;;  %v3108_v31 = vld [vmem:[%s4944_s1 + $0xf4] sm:$0xf0]  ;;  %v613_v32 = vld [vmem:[%s4945_s2 + $0xa8] sm:$0xff] }
  0xc6   :  { %v3371_v43 = vpop.permute.xlu1 %3370  ;;  %v3105_v37 = vld [vmem:[%s4944_s1 + $0xe4] sm:$0xf]  ;;  %v3115_v13 = vld [vmem:[%s4944_s1 + $0x12c] sm:$0xf0]  ;;  %v2706_v23 = vld [vmem:[%s4944_s1 + $0x128] sm:$0xf] }
  0xc7   :  { %v3366_v47 = vpop.permute.xlu0 %3365  ;;  %v3373_v48 = vunpack.i.h.bf16 %v3371_v43  ;;  %v3372_v49 = vunpack.i.l.bf16 %v3371_v43  ;;  %1290 = vmatmul.bf16.vlgmr.msra.gmra.mxu2 %v2563_v42  ;;  %v2619_v42 = vor.u32 %v3095_v41, %v2618_v40  ;;  %v2626_v43 = vld [vmem:[%s4944_s1 + $0x88] sm:$0xf]  ;;  %v2676_v41 = vld [vmem:[%s4944_s1 + $0xf8] sm:$0xf0] }
  0xc8   :  { %v3368_v53 = vunpack.i.h.bf16 %v3366_v47  ;;  %v3367_v54 = vunpack.i.l.bf16 %v3366_v47 }
  0xc9   :  { %v448_v57 = vsel %vm431_vm0, %v62_v44, %v3372_v49  ;;  %v449_v58 = vsel %vm431_vm0, %v63_v45, %v3373_v48  ;;  %v3096_v44 = vld [vmem:[%s4944_s1 + $0x94] sm:$0xf0]  ;;  %v3093_v48 = vld [vmem:[%s4944_s1 + $0x84] sm:$0xf]  ;;  %v2620_v49 = vld [vmem:[%s4944_s1 + $0x90] sm:$0xf0] }
  0xca   :  { %v568_v61 = vpack.c.bf16 %v449_v58, %v448_v57  ;;  %v480_v62 = vsel %vm431_vm0, %v94_v46, %v3367_v54  ;;  %v481_v63 = vsel %vm431_vm0, %v95_v50, %v3368_v53  ;;  %v2627_v47 = vor.u32 %v3096_v44, %v2626_v43  ;;  %v3094_v50 = vld [vmem:[%s4944_s1 + $0x8c] sm:$0xf]  ;;  %v3099_v57 = vld [vmem:[%s4944_s1 + $0xac] sm:$0xf0]  ;;  %736 = vperm.xlu0 %3375, %v614_v20  }
  0xcb   :  { %v584_v0 = vpack.c.bf16 %v481_v63, %v480_v62  ;;  %v2623_v54 = vor.u32 %v3093_v48, %v2620_v49  ;;  %v2631_v55 = vor.u32 %v3094_v50, %v2628_v51  ;;  %v2635_v58 = vor.u32 %v3099_v57, %v2634_v56  ;;  %v609_v43 = vld [vmem:[%s4945_s2 + $0x88] sm:$0xff]  ;;  %v2682_v49 = vld [vmem:[%s4944_s1 + $0x100] sm:$0xf]  ;;  %v3111_v50 = vld [vmem:[%s4944_s1 + $0x10c] sm:$0xf0] }
  0xcc   :  { %1200 = vmatpush.bf16.msra.mxu1 %v568_v61  ;;  %v2643_v61 = vor.u32 %v3100_v60, %v2642_v59  ;;  %v2690_v56 = vld [vmem:[%s4944_s1 + $0x108] sm:$0xf]  ;;  %v3112_v57 = vld [vmem:[%s4944_s1 + $0x114] sm:$0xf0] }
  0xcd   :  { %1378 = vmatpush.bf16.msra.mxu3 %v584_v0  ;;  %v3097_v0 = vld [vmem:[%s4944_s1 + $0xa4] sm:$0xf]  ;;  %v2691_v59 = vor.u32 %v3112_v57, %v2690_v56  ;;  %v2714_v57 = vld [vmem:[%s4944_s1 + $0x140] sm:$0xf] }
  0xce   :  { %v4147_v46 = vpop.permute.xlu1 %686 }
  0xcf   :  { %1201 = vmatmul.bf16.vlgmr.msra.gmra.mxu1 %v2559_v1  ;;  %v2636_v1 = vld [vmem:[%s4944_s1 + $0xb0] sm:$0xf0] }
  0xd0   :  { %1379 = vmatmul.bf16.vlgmr.msra.gmra.mxu3 %v2567_v2  ;;  %v3098_v2 = vld [vmem:[%s4944_s1 + $0xac] sm:$0xf]  ;;  %v2639_v4 = vor.u32 %v3097_v0, %v2636_v1  ;;  %v3109_v1 = vld [vmem:[%s4944_s1 + $0x104] sm:$0xf] }
  0xd2   :  { %731 = vperm.xlu0 %3375, %v613_v32  }
  0xd3   :  { %1117 = vmatmul.bf16.gmra.mxu0 %v2571_v5  ;;  %v2647_v5 = vor.u32 %v3098_v2, %v2644_v3  ;;  %v2684_v2 = vld [vmem:[%s4944_s1 + $0x110] sm:$0xf0] }
  0xd4   :  { %v2687_v7 = vor.u32 %v3109_v1, %v2684_v2 }
  0xd7   :  { %1295 = vmatmul.bf16.gmra.mxu2 %v2579_v9 }
  0xdc   :  { %v4145_v45 = vpop.permute.xlu2 %696 }
  0xdf   :  { %1206 = vmatmul.bf16.gmra.mxu1 %v2575_v14  ;;  %v2659_v14 = vor.u32 %v3104_v12, %v2658_v11  ;;  %v2698_v12 = vld [vmem:[%s4944_s1 + $0x120] sm:$0xf] }
  0xe0   :  { %1384 = vmatmul.bf16.gmra.mxu3 %v2583_v15  ;;  %v2699_v20 = vor.u32 %v3115_v13, %v2698_v12 }
  0xe3   :  { %1122 = vmatmul.bf16.gmra.mxu0 %v2587_v18  ;;  %v2652_v18 = vld [vmem:[%s4944_s1 + $0xd0] sm:$0xf0] }
  0xe4   :  { %v4161_v52 = vpop.permute.xlu2 %691  ;;  %v2655_v24 = vor.u32 %v3101_v16, %v2652_v18 }
  0xe7   :  { %1300 = vmatmul.bf16.gmra.mxu2 %v2595_v21  ;;  %v615_v21 = vld [vmem:[%s4945_s2 + $0xb8] sm:$0xff] }
  0xe8   :  { %741 = vperm.xlu1 %3376, %v615_v21  }
  0xec   :  { %v4163_v53 = vpop.permute.xlu1 %676  ;;  %v4177_v62 = vpop.permute.xlu2 %681 }
  0xef   :  { %1211 = vmatmul.bf16.gmra.mxu1 %v2591_v26  ;;  %v2666_v26 = vld [vmem:[%s4944_s1 + $0xe0] sm:$0xf] }
  0xf0   :  { %1389 = vmatmul.bf16.gmra.mxu3 %v2599_v27  ;;  %v3107_v27 = vld [vmem:[%s4944_s1 + $0xec] sm:$0xf0] }
  0xf1   :  { %v2667_v29 = vor.u32 %v3107_v27, %v2666_v26 }
  0xf3   :  { %1127 = vmatmul.bf16.gmra.mxu0 %v2603_v30  ;;  %v2674_v30 = vld [vmem:[%s4944_s1 + $0xe8] sm:$0xf] }
  0xf4   :  { %v2675_v36 = vor.u32 %v3108_v31, %v2674_v30 }
  0xf5   :  { %v4179_v63 = vpop.permute.xlu1 %671  ;;  %v4199_v8 = vpop.permute.xlu2 %776 }
  0xf7   :  { %1305 = vmatmul.bf16.gmra.mxu2 %v2611_v33  ;;  %v610_v33 = vld [vmem:[%s4945_s2 + $0x90] sm:$0xff] }
  0xf8   :  { %716 = vperm.xlu1 %3376, %v610_v33  }
  0xfd   :  { %v4201_v9 = vpop.permute.xlu1 %656  ;;  %v4217_v17 = vpop.permute.xlu2 %661 }
  0xff   :  { %1216 = vmatmul.bf16.gmra.mxu1 %v2607_v38  ;;  %v2668_v38 = vld [vmem:[%s4944_s1 + $0xf0] sm:$0xf0] }
 0x100   :  { %1394 = vmatmul.bf16.gmra.mxu3 %v2615_v39  ;;  %v3106_v39 = vld [vmem:[%s4944_s1 + $0xec] sm:$0xf]  ;;  %711 = vperm.xlu1 %3376, %v609_v43   ;;  %v2671_v44 = vor.u32 %v3105_v37, %v2668_v38  ;;  %v3113_v38 = vld [vmem:[%s4944_s1 + $0x124] sm:$0xf]  ;;  %v2708_v43 = vld [vmem:[%s4944_s1 + $0x138] sm:$0xf0] }
 0x101   :  { %v2679_v48 = vor.u32 %v3106_v39, %v2676_v41  ;;  %v2700_v39 = vld [vmem:[%s4944_s1 + $0x130] sm:$0xf0] }
 0x102   :  { %v4212_v15 = vpop.permute.xlu0 %701 }
 0x103   :  { %1132 = vmatmul.bf16.gmra.mxu0 %v2619_v42  ;;  %v608_v42 = vld [vmem:[%s4945_s2 + $0x80] sm:$0xff] }
 0x104   :  { %706 = vperm.xlu0 %3375, %v608_v42   ;;  %v3114_v42 = vld [vmem:[%s4944_s1 + $0x12c] sm:$0xf] }
 0x105   :  { %v4222_v19 = vpop.permute.xlu1 %771  ;;  %v4256_v34 = vpop.permute.xlu2 %646  ;;  %v2711_v56 = vor.u32 %v3114_v42, %v2708_v43 }
 0x107   :  { %1310 = vmatmul.bf16.gmra.mxu2 %v2627_v47 }
 0x10c   :  { %v4242_v28 = vpop.permute.xlu0 %666 }
 0x10d   :  { %v4258_v35 = vpop.permute.xlu1 %756  ;;  %v4280_v47 = vpop.permute.xlu2 %761 }
 0x10f   :  { %1221 = vmatmul.bf16.gmra.mxu1 %v2623_v54  ;;  %v2683_v54 = vor.u32 %v3111_v50, %v2682_v49  ;;  %v2703_v50 = vor.u32 %v3113_v38, %v2700_v39 }
 0x110   :  { %1399 = vmatmul.bf16.gmra.mxu3 %v2631_v55 }
 0x113   :  { %1137 = vmatmul.bf16.gmra.mxu0 %v2635_v58 }
 0x114   :  { %v4269_v40 = vpop.permute.xlu0 %781 }
 0x115   :  { %v4288_v51 = vpop.permute.xlu1 %641  ;;  %v4298_v60 = vpop.permute.xlu2 %746 }
 0x117   :  { %1315 = vmatmul.bf16.gmra.mxu2 %v2643_v61 }
 0x11c   :  { %v4296_v58 = vpop.permute.xlu0 %766 }
 0x11d   :  { %v627_v61 = vpop.permute.xlu1 %626  ;;  %v632_v21 = vpop.permute.xlu2 %631 }
 0x11f   :  { %1226 = vmatmul.bf16.gmra.mxu1 %v2639_v4  ;;  %v3110_v4 = vld [vmem:[%s4944_s1 + $0x10c] sm:$0xf] }
 0x120   :  { %1404 = vmatmul.bf16.gmra.mxu3 %v2647_v5  ;;  %v2692_v5 = vld [vmem:[%s4944_s1 + $0x118] sm:$0xf0] }
 0x121   :  { %v2695_v11 = vor.u32 %v3110_v4, %v2692_v5  ;;  %v2722_v5 = vld [vmem:[%s4944_s1 + $0x148] sm:$0xf] }
 0x123   :  { %1142 = vmatmul.bf16.gmra.mxu0 %v2651_v10 }
 0x127   :  { %1320 = vmatmul.bf16.gmra.mxu2 %v2659_v14  ;;  %v4318_v14 = vpop.permute.xlu0 %651 }
 0x12f   :  { %1231 = vmatmul.bf16.gmra.mxu1 %v2655_v24  ;;  %v3116_v24 = vld [vmem:[%s4944_s1 + $0x134] sm:$0xf0]  ;;  %v637_v33 = vpop.permute.xlu0 %636 }
 0x130   :  { %1409 = vmatmul.bf16.gmra.mxu3 %v2663_v25 }
 0x133   :  { %1147 = vmatmul.bf16.gmra.mxu0 %v2667_v29  ;;  %v2707_v29 = vor.u32 %v3116_v24, %v2706_v23  ;;  %v3117_v24 = vld [vmem:[%s4944_s1 + $0x144] sm:$0xf] }
 0x137   :  { %1325 = vmatmul.bf16.gmra.mxu2 %v2675_v36 }
 0x13f   :  { %1236 = vmatmul.bf16.gmra.mxu1 %v2671_v44  ;;  %v612_v44 = vld [vmem:[%s4945_s2 + $0xa0] sm:$0xff] }
 0x140   :  { %1414 = vmatmul.bf16.gmra.mxu3 %v2679_v48  ;;  %v1113_v55 = vpop.f32.mrf.mxu0  ;;  %726 = vperm.xlu2 %3374, %v612_v44  }
 0x141   :  { %v1114_v3 = vadd.f32 %v1113_v55, %v627_v61 }
 0x143   :  { %1152 = vmatmul.bf16.gmra.mxu0 %v2683_v54 }
 0x147   :  { %1330 = vmatmul.bf16.gmra.mxu2 %v2691_v59  ;;  %v3119_v59 = vld [vmem:[%s4944_s1 + $0x14c] sm:$0xf0] }
 0x148   :  { %v1115_v0 = vpop.f32.mrf.mxu0 }
 0x149   :  { %v1116_v26 = vadd.f32 %v1115_v0, %v632_v21 }
 0x14a   :  { %v1291_v6 = vpop.f32.mrf.mxu2 }
 0x14c   :  { %v1202_v10 = vpop.f32.mrf.mxu1 }
 0x14d   :  { %v1203_v16 = vadd.f32 %v1202_v10, %v1114_v3  ;;  %v2715_v3 = vor.u32 %v3119_v59, %v2714_v57  ;;  %v611_v10 = vld [vmem:[%s4945_s2 + $0x98] sm:$0xff] }
 0x14e   :  { %721 = vperm.xlu2 %3374, %v611_v10  }
 0x14f   :  { %1241 = vmatmul.bf16.gmra.mxu1 %v2687_v7  ;;  %v1292_v18 = vadd.f32 %v1291_v6, %v1203_v16  ;;  %v3120_v6 = vld [vmem:[%s4944_s1 + $0x154] sm:$0xf0] }
 0x150   :  { %1419 = vmatmul.bf16.gmra.mxu3 %v2695_v11  ;;  %v1118_v22 = vpop.f32.mrf.mxu0  ;;  %v2723_v16 = vor.u32 %v3120_v6, %v2722_v5  ;;  %v2740_v6 = vld [vmem:[%s4944_s1 + $0x178] sm:$0xf0] }
 0x151   :  { %v1119_v41 = vadd.f32 %v1118_v22, %v637_v33 }
 0x152   :  { %v1293_v25 = vpop.f32.mrf.mxu2 }
 0x153   :  { %v1380_v27 = vpop.f32.mrf.mxu3  ;;  %1157 = vmatmul.bf16.gmra.mxu0 %v2699_v20 }
 0x154   :  { %v1381_v30 = vadd.f32 %v1380_v27, %v1292_v18  ;;  %v1204_v31 = vpop.f32.mrf.mxu1  ;;  %v2724_v27 = vld [vmem:[%s4944_s1 + $0x158] sm:$0xf0] }
 0x155   :  { %v1205_v32 = vadd.f32 %v1204_v31, %v1116_v26 }
 0x156   :  { %v1460_v0 = vmax.f32 %v1381_v30, 0.0 }
 0x157   :  { %1335 = vmatmul.bf16.gmra.mxu2 %v2707_v29  ;;  %v1294_v36 = vadd.f32 %v1293_v25, %v1205_v32  ;;  %v2716_v25 = vld [vmem:[%s4944_s1 + $0x150] sm:$0xf0] }
 0x158   :  { %v1120_v37 = vpop.f32.mrf.mxu0  ;;  %v2719_v31 = vor.u32 %v3117_v24, %v2716_v25  ;;  %v1515_v24 = vld [vmem:[%s4947_s4 + $0x18] sm:$0xff]  ;;  %v1512_v25 = vld [vmem:[%s4947_s4] sm:$0xff] }
 0x159   :  { %v1121_v12 = vadd.f32 %v1120_v37, %v4288_v51  ;;  %v3118_v51 = vld [vmem:[%s4944_s1 + $0x14c] sm:$0xf]  ;;  %v2730_v37 = vld [vmem:[%s4944_s1 + $0x160] sm:$0xf]  ;;  %1533 = vperm.xlu0 %3375, %v1515_v24   ;;  %1518 = vperm.xlu1 %3376, %v1512_v25   ;;  %v3129_v24 = vld [vmem:[%s4944_s1 + $0x1a4] sm:$0xf] }
 0x15a   :  { %v1296_v48 = vpop.f32.mrf.mxu2  ;;  %v2764_v25 = vld [vmem:[%s4944_s1 + $0x1b0] sm:$0xf0] }
 0x15b   :  { %v1382_v49 = vpop.f32.mrf.mxu3 }
 0x15c   :  { %v1383_v54 = vadd.f32 %v1382_v49, %v1294_v36  ;;  %v1207_v55 = vpop.f32.mrf.mxu1  ;;  %v2727_v36 = vor.u32 %v3118_v51, %v2724_v27  ;;  %v3124_v49 = vld [vmem:[%s4944_s1 + $0x174] sm:$0xf0] }
 0x15d   :  { %v1208_v61 = vadd.f32 %v1207_v55, %v1119_v41 }
 0x15e   :  { %v1461_v1 = vmax.f32 %v1383_v54, 0.0 }
 0x15f   :  { %1246 = vmatmul.bf16.gmra.mxu1 %v2703_v50  ;;  %v1297_v2 = vadd.f32 %v1296_v48, %v1208_v61  ;;  %v2738_v48 = vld [vmem:[%s4944_s1 + $0x168] sm:$0xf] }
 0x160   :  { %1424 = vmatmul.bf16.gmra.mxu3 %v2711_v56  ;;  %v1123_v4 = vpop.f32.mrf.mxu0  ;;  %v4353_v7 = vpack.c.bf16 %v1461_v1, %v1460_v0  ;;  %v2739_v57 = vor.u32 %v3124_v49, %v2738_v48  ;;  %v3126_v49 = vld [vmem:[%s4944_s1 + $0x18c] sm:$0xf] }
 0x161   :  { %v1124_v26 = vadd.f32 %v1123_v4, %v4256_v34  ;;  %v3123_v34 = vld [vmem:[%s4944_s1 + $0x16c] sm:$0xf0]  ;;  %v2732_v4 = vld [vmem:[%s4944_s1 + $0x170] sm:$0xf0] }
 0x162   :  { %v1298_v11 = vpop.f32.mrf.mxu2  ;;  %v2731_v43 = vor.u32 %v3123_v34, %v2730_v37 }
 0x163   :  { %v1385_v13 = vpop.f32.mrf.mxu3  ;;  %1162 = vmatmul.bf16.gmra.mxu0 %v2715_v3  ;;  %v3121_v3 = vld [vmem:[%s4944_s1 + $0x164] sm:$0xf] }
 0x164   :  { %v1386_v18 = vadd.f32 %v1385_v13, %v1297_v2  ;;  %v1209_v20 = vpop.f32.mrf.mxu1 }
 0x165   :  { %v1210_v21 = vadd.f32 %v1209_v20, %v1121_v12  ;;  %v2735_v12 = vor.u32 %v3121_v3, %v2732_v4  ;;  %v2746_v20 = vld [vmem:[%s4944_s1 + $0x180] sm:$0xf] }
 0x166   :  { %v1462_v39 = vmax.f32 %v1386_v18, 0.0 }
 0x167   :  { %1340 = vmatmul.bf16.gmra.mxu2 %v2723_v16  ;;  %v1299_v22 = vadd.f32 %v1298_v11, %v1210_v21 }
 0x168   :  { %v1125_v23 = vpop.f32.mrf.mxu0 }
 0x169   :  { %v1126_v55 = vadd.f32 %v1125_v23, %v4318_v14  ;;  %v3122_v14 = vld [vmem:[%s4944_s1 + $0x16c] sm:$0xf] }
 0x16a   :  { %v1301_v29 = vpop.f32.mrf.mxu2  ;;  %v2743_v18 = vor.u32 %v3122_v14, %v2740_v6 }
 0x16b   :  { %v1387_v30 = vpop.f32.mrf.mxu3 }
 0x16c   :  { %v1388_v32 = vadd.f32 %v1387_v30, %v1299_v22  ;;  %v1212_v33 = vpop.f32.mrf.mxu1  ;;  %v3128_v30 = vld [vmem:[%s4944_s1 + $0x194] sm:$0xf0] }
 0x16d   :  { %v1213_v38 = vadd.f32 %v1212_v33, %v1124_v26 }
 0x16e   :  { %v1463_v41 = vmax.f32 %v1388_v32, 0.0 }
 0x16f   :  { %1251 = vmatmul.bf16.gmra.mxu1 %v2719_v31  ;;  %v1302_v42 = vadd.f32 %v1301_v29, %v1213_v38  ;;  %v2754_v29 = vld [vmem:[%s4944_s1 + $0x188] sm:$0xf] }
 0x170   :  { %1429 = vmatmul.bf16.gmra.mxu3 %v2727_v36  ;;  %v1128_v44 = vpop.f32.mrf.mxu0  ;;  %v4384_v50 = vpack.c.bf16 %v1463_v41, %v1462_v39  ;;  %v2755_v37 = vor.u32 %v3128_v30, %v2754_v29  ;;  %v1601_v41 = vld [vmem:[%s4949_s6] sm:$0xf]  ;;  %v2767_v30 = vor.u32 %v3129_v24, %v2764_v25 }
 0x171   :  { %v1129_v5 = vadd.f32 %v1128_v44, %v4201_v9  ;;  %v3127_v9 = vld [vmem:[%s4944_s1 + $0x18c] sm:$0xf0]  ;;  %1604 = vperm.xlu0 %3375, %v1601_v41   ;;  %v3125_v44 = vld [vmem:[%s4944_s1 + $0x184] sm:$0xf]  ;;  %v3136_v41 = vld [vmem:[%s4944_s1 + $0x1d4] sm:$0xf0] }
 0x172   :  { %v1303_v54 = vpop.f32.mrf.mxu2  ;;  %v2747_v51 = vor.u32 %v3127_v9, %v2746_v20 }
 0x173   :  { %v1390_v56 = vpop.f32.mrf.mxu3  ;;  %1167 = vmatmul.bf16.gmra.mxu0 %v2731_v43 }
 0x174   :  { %v1391_v59 = vadd.f32 %v1390_v56, %v1302_v42  ;;  %v1214_v61 = vpop.f32.mrf.mxu1  ;;  %v1514_v56 = vld [vmem:[%s4947_s4 + $0x10] sm:$0xff] }
 0x175   :  { %v1215_v0 = vadd.f32 %v1214_v61, %v1126_v55  ;;  %1528 = vperm.xlu2 %3374, %v1514_v56   ;;  %v4509_v56 = vpop.permute.xlu0 %751 }
 0x176   :  { %v1464_v22 = vmax.f32 %v1391_v59, 0.0 }
 0x177   :  { %1345 = vmatmul.bf16.gmra.mxu2 %v2739_v57  ;;  %v1304_v1 = vadd.f32 %v1303_v54, %v1215_v0  ;;  %v2756_v54 = vld [vmem:[%s4944_s1 + $0x198] sm:$0xf0] }
 0x178   :  { %v1130_v2 = vpop.f32.mrf.mxu0 }
 0x179   :  { %v1131_v33 = vadd.f32 %v1130_v2, %v4217_v17  ;;  %v2748_v17 = vld [vmem:[%s4944_s1 + $0x190] sm:$0xf0]  ;;  %v3131_v2 = vld [vmem:[%s4944_s1 + $0x1ac] sm:$0xf0] }
 0x17a   :  { %v1306_v10 = vpop.f32.mrf.mxu2  ;;  %v2751_v59 = vor.u32 %v3125_v44, %v2748_v17 }
 0x17b   :  { %v1392_v11 = vpop.f32.mrf.mxu3 }
 0x17c   :  { %v1393_v13 = vadd.f32 %v1392_v11, %v1304_v1  ;;  %v1217_v16 = vpop.f32.mrf.mxu1  ;;  %v2759_v1 = vor.u32 %v3126_v49, %v2756_v54  ;;  %v2770_v11 = vld [vmem:[%s4944_s1 + $0x1a8] sm:$0xf]  ;;  %v3133_v54 = vld [vmem:[%s4944_s1 + $0x1c4] sm:$0xf] }
 0x17d   :  { %v1218_v21 = vadd.f32 %v1217_v16, %v1129_v5 }
 0x17e   :  { %v1465_v23 = vmax.f32 %v1393_v13, 0.0 }
 0x17f   :  { %1256 = vmatmul.bf16.gmra.mxu1 %v2735_v12  ;;  %v1307_v26 = vadd.f32 %v1306_v10, %v1218_v21  ;;  %v3132_v12 = vld [vmem:[%s4944_s1 + $0x1b4] sm:$0xf0] }
 0x180   :  { %1434 = vmatmul.bf16.gmra.mxu3 %v2743_v18  ;;  %v1133_v27 = vpop.f32.mrf.mxu0  ;;  %v4418_v31 = vpack.c.bf16 %v1465_v23, %v1464_v22  ;;  %v1513_v18 = vld [vmem:[%s4947_s4 + $0x8] sm:$0xff]  ;;  %v2771_v9 = vor.u32 %v3132_v12, %v2770_v11  ;;  %v3140_v11 = vld [vmem:[%s4944_s1 + $0x1f4] sm:$0xf0] }
 0x181   :  { %v1134_v48 = vadd.f32 %v1133_v27, %v4242_v28  ;;  %v2762_v28 = vld [vmem:[%s4944_s1 + $0x1a0] sm:$0xf]  ;;  %1523 = vperm.xlu2 %3374, %v1513_v18   ;;  %v4531_v18 = vpop.permute.xlu0 %736 }
 0x182   :  { %v1308_v32 = vpop.f32.mrf.mxu2  ;;  %v2763_v6 = vor.u32 %v3131_v2, %v2762_v28 }
 0x183   :  { %v1395_v36 = vpop.f32.mrf.mxu3  ;;  %1172 = vmatmul.bf16.gmra.mxu0 %v2747_v51  ;;  %v2772_v51 = vld [vmem:[%s4944_s1 + $0x1b8] sm:$0xf0] }
 0x184   :  { %v1396_v34 = vadd.f32 %v1395_v36, %v1307_v26  ;;  %v1219_v38 = vpop.f32.mrf.mxu1  ;;  %v3130_v26 = vld [vmem:[%s4944_s1 + $0x1ac] sm:$0xf]  ;;  %v2778_v36 = vld [vmem:[%s4944_s1 + $0x1c0] sm:$0xf] }
 0x185   :  { %v1220_v39 = vadd.f32 %v1219_v38, %v1131_v33  ;;  %v2775_v33 = vor.u32 %v3130_v26, %v2772_v51  ;;  %v3137_v26 = vld [vmem:[%s4944_s1 + $0x1e4] sm:$0xf]  ;;  %v2796_v51 = vld [vmem:[%s4944_s1 + $0x1f0] sm:$0xf0] }
 0x186   :  { %v1466_v4 = vmax.f32 %v1396_v34, 0.0 }
 0x187   :  { %1350 = vmatmul.bf16.gmra.mxu2 %v2755_v37  ;;  %v1309_v42 = vadd.f32 %v1308_v32, %v1220_v39  ;;  %v3135_v37 = vld [vmem:[%s4944_s1 + $0x1cc] sm:$0xf0]  ;;  %v2786_v39 = vld [vmem:[%s4944_s1 + $0x1c8] sm:$0xf] }
 0x188   :  { %v4424_v43 = vpop.f32.mrf.mxu0  ;;  %v2779_v34 = vor.u32 %v3135_v37, %v2778_v36  ;;  %v2787_v17 = vor.u32 %v3136_v41, %v2786_v39 }
 0x18a   :  { %v1311_v55 = vpop.f32.mrf.mxu2 }
 0x18b   :  { %v1397_v57 = vpop.f32.mrf.mxu3 }
 0x18c   :  { %v1398_v61 = vadd.f32 %v1397_v57, %v1309_v42  ;;  %v1222_v0 = vpop.f32.mrf.mxu1  ;;  %v3134_v57 = vld [vmem:[%s4944_s1 + $0x1cc] sm:$0xf] }
 0x18d   :  { %v1223_v3 = vadd.f32 %v1222_v0, %v1134_v48 }
 0x18e   :  { %v1467_v5 = vmax.f32 %v1398_v61, 0.0 }
 0x18f   :  { %1261 = vmatmul.bf16.gmra.mxu1 %v2751_v59  ;;  %v1312_v14 = vadd.f32 %v1311_v55, %v1223_v3  ;;  %v2780_v55 = vld [vmem:[%s4944_s1 + $0x1d0] sm:$0xf0]  ;;  %v2788_v59 = vld [vmem:[%s4944_s1 + $0x1d8] sm:$0xf0]  ;;  %v2794_v3 = vld [vmem:[%s4944_s1 + $0x1e0] sm:$0xf] }
 0x190   :  { %1439 = vmatmul.bf16.gmra.mxu3 %v2759_v1  ;;  %v4448_v10 = vpop.f32.mrf.mxu0  ;;  %v4456_v13 = vpack.c.bf16 %v1467_v5, %v1466_v4  ;;  %v2783_v1 = vor.u32 %v3133_v54, %v2780_v55  ;;  %v2791_v2 = vor.u32 %v3134_v57, %v2788_v59  ;;  %v3139_v4 = vld [vmem:[%s4944_s1 + $0x1ec] sm:$0xf0] }
 0x191   :  { %v2795_v5 = vor.u32 %v3139_v4, %v2794_v3 }
 0x192   :  { %v4458_v16 = vpop.f32.mrf.mxu2 }
 0x193   :  { %v1400_v20 = vpop.f32.mrf.mxu3  ;;  %1177 = vmatmul.bf16.gmra.mxu0 %v2763_v6  ;;  %v2802_v6 = vld [vmem:[%s4944_s1 + $0x1e8] sm:$0xf] }
 0x194   :  { %v4463_v21 = vadd.f32 %v1400_v20, %v1312_v14  ;;  %v4465_v22 = vpop.f32.mrf.mxu1 }
 0x197   :  { %1355 = vmatmul.bf16.gmra.mxu2 %v2771_v9  ;;  %v2803_v9 = vor.u32 %v3140_v11, %v2802_v6  ;;  %v1139_v6 = vadd.f32 %v4448_v10, %v4163_v53  ;;  %v1136_v53 = vadd.f32 %v4424_v43, %v4179_v63 }
 0x198   :  { %v4467_v23 = vpop.f32.mrf.mxu0 }
 0x19a   :  { %v4481_v27 = vpop.f32.mrf.mxu2 }
 0x19b   :  { %v4483_v29 = vpop.f32.mrf.mxu3 }
 0x19c   :  { %v4485_v32 = vpop.f32.mrf.mxu1 }
 0x19f   :  { %1266 = vmatmul.bf16.gmra.mxu1 %v2767_v30  ;;  %v3138_v30 = vld [vmem:[%s4944_s1 + $0x1ec] sm:$0xf] }
 0x1a0   :  { %1444 = vmatmul.bf16.gmra.mxu3 %v2775_v33  ;;  %v1143_v38 = vpop.f32.mrf.mxu0  ;;  %v2804_v33 = vld [vmem:[%s4944_s1 + $0x1f8] sm:$0xf0] }
 0x1a1   :  { %v2807_v41 = vor.u32 %v3138_v30, %v2804_v33  ;;  %v1144_v57 = vadd.f32 %v1143_v38, %v4147_v46  ;;  %v1228_v38 = vadd.f32 %v4485_v32, %v1139_v6 }
 0x1a2   :  { %v4499_v42 = vpop.f32.mrf.mxu2 }
 0x1a3   :  { %v4501_v44 = vpop.f32.mrf.mxu3  ;;  %1182 = vmatmul.bf16.gmra.mxu0 %v2779_v34  ;;  %v2799_v34 = vor.u32 %v3137_v26, %v2796_v51  ;;  %v1141_v51 = vadd.f32 %v4467_v23, %v4177_v62  ;;  %v1225_v62 = vadd.f32 %v4465_v22, %v1136_v53  ;;  %v1317_v23 = vadd.f32 %v4481_v27, %v1228_v38 }
 0x1a4   :  { %v1229_v48 = vpop.f32.mrf.mxu1 }
 0x1a5   :  { %v1230_v30 = vadd.f32 %v1229_v48, %v1141_v51  ;;  %v1406_v22 = vadd.f32 %v4501_v44, %v1317_v23 }
 0x1a7   :  { %1360 = vmatmul.bf16.gmra.mxu2 %v2787_v17  ;;  %v4545_v17 = vpop.permute.xlu0 %731  ;;  %v1319_v32 = vadd.f32 %v4499_v42, %v1230_v30 }
 0x1a8   :  { %v1145_v49 = vpop.f32.mrf.mxu0 }
 0x1a9   :  { %v1146_v3 = vadd.f32 %v1145_v49, %v4161_v52 }
 0x1aa   :  { %v1321_v61 = vpop.f32.mrf.mxu2 }
 0x1ab   :  { %v4517_v0 = vpop.f32.mrf.mxu3 }
 0x1ac   :  { %v1232_v28 = vpop.f32.mrf.mxu1 }
 0x1ad   :  { %v1233_v11 = vadd.f32 %v1232_v28, %v1144_v57  ;;  %v1314_v57 = vadd.f32 %v4458_v16, %v1225_v62 }
 0x1af   :  { %1271 = vmatmul.bf16.gmra.mxu1 %v2783_v1  ;;  %v1322_v49 = vadd.f32 %v1321_v61, %v1233_v11  ;;  %v4563_v61 = vpop.permute.xlu1 %741 }
 0x1b0   :  { %1449 = vmatmul.bf16.gmra.mxu3 %v2791_v2  ;;  %v1148_v14 = vpop.f32.mrf.mxu0 }
 0x1b1   :  { %v1149_v54 = vadd.f32 %v1148_v14, %v4145_v45  ;;  %v707_v14 = vpop.permute.xlu0 %706 }
 0x1b2   :  { %v1323_v12 = vpop.f32.mrf.mxu2 }
 0x1b3   :  { %v1410_v20 = vpop.f32.mrf.mxu3  ;;  %1187 = vmatmul.bf16.gmra.mxu0 %v2795_v5 }
 0x1b4   :  { %v1234_v24 = vpop.f32.mrf.mxu1  ;;  %v1411_v48 = vadd.f32 %v1410_v20, %v1322_v49  ;;  %v1403_v20 = vadd.f32 %v4483_v29, %v1314_v57 }
 0x1b7   :  { %1365 = vmatmul.bf16.gmra.mxu2 %v2803_v9  ;;  %v1235_v9 = vadd.f32 %v1234_v24, %v1146_v3  ;;  %v717_v6 = vpop.permute.xlu1 %716 }
 0x1b8   :  { %v1150_v25 = vpop.f32.mrf.mxu0 }
 0x1b9   :  { %v1151_v4 = vadd.f32 %v1150_v25, %v4212_v15  ;;  %v1324_v15 = vadd.f32 %v1323_v12, %v1235_v9  ;;  %v1468_v9 = vmax.f32 %v4463_v21, 0.0  ;;  %v727_v21 = vpop.permute.xlu2 %726 }
 0x1ba   :  { %v1326_v36 = vpop.f32.mrf.mxu2 }
 0x1bb   :  { %v1412_v37 = vpop.f32.mrf.mxu3 }
 0x1bc   :  { %v1237_v39 = vpop.f32.mrf.mxu1  ;;  %v1413_v28 = vadd.f32 %v1412_v37, %v1324_v15 }
 0x1bd   :  { %v1238_v59 = vadd.f32 %v1237_v39, %v1149_v54 }
 0x1be   :  { %v1473_v63 = vmax.f32 %v1413_v28, 0.0 }
 0x1bf   :  { %1276 = vmatmul.bf16.gmra.mxu1 %v2799_v34  ;;  %v1327_v26 = vadd.f32 %v1326_v36, %v1238_v59  ;;  %v1472_v59 = vmax.f32 %v1411_v48, 0.0 }
 0x1c0   :  { %1454 = vmatmul.bf16.gmra.mxu3 %v2807_v41  ;;  %v1153_v55 = vpop.f32.mrf.mxu0 }
 0x1c1   :  { %v1154_v52 = vadd.f32 %v1153_v55, %v707_v14  ;;  %v1408_v55 = vadd.f32 %v4517_v0, %v1319_v32  ;;  %v1502_v0 = vpack.c.bf16 %v1473_v63, %v1472_v59 }
 0x1c2   :  { %v1328_v1 = vpop.f32.mrf.mxu2 }
 0x1c3   :  { %v1415_v2 = vpop.f32.mrf.mxu3 }
 0x1c4   :  { %v1239_v5 = vpop.f32.mrf.mxu1  ;;  %v1416_v25 = vadd.f32 %v1415_v2, %v1327_v26 }
 0x1c5   :  { %v1240_v45 = vadd.f32 %v1239_v5, %v1151_v4  ;;  %v1470_v4 = vmax.f32 %v1406_v22, 0.0  ;;  %v1469_v5 = vmax.f32 %v1403_v20, 0.0 }
 0x1c6   :  { %v1474_v12 = vmax.f32 %v1416_v25, 0.0 }
 0x1c7   :  { %v1329_v34 = vadd.f32 %v1328_v1, %v1240_v45  ;;  %v1471_v1 = vmax.f32 %v1408_v55, 0.0  ;;  %v1500_v14 = vpack.c.bf16 %v1469_v5, %v1468_v9 }
 0x1c8   :  { %v4555_v46 = vpop.f32.mrf.mxu0 }
 0x1c9   :  { %v1501_v44 = vpack.c.bf16 %v1471_v1, %v1470_v4 }
 0x1ca   :  { %v1331_v33 = vpop.f32.mrf.mxu2 }
 0x1cb   :  { %v1417_v10 = vpop.f32.mrf.mxu3 }
 0x1cc   :  { %v1418_v24 = vadd.f32 %v1417_v10, %v1329_v34  ;;  %v1242_v36 = vpop.f32.mrf.mxu1  ;;  %v2810_v10 = vld [vmem:[%s4946_s3] sm:$0xf] }
 0x1cd   :  { %v1243_v39 = vadd.f32 %v1242_v36, %v1154_v52 }
 0x1ce   :  { %v1475_v41 = vmax.f32 %v1418_v24, 0.0 }
 0x1cf   :  { %v1332_v54 = vadd.f32 %v1331_v33, %v1243_v39 }
 0x1d0   :  { %v1158_v43 = vpop.f32.mrf.mxu0  ;;  %v1503_v37 = vpack.c.bf16 %v1475_v41, %v1474_v12 }
 0x1d1   :  { %v1159_v11 = vadd.f32 %v1158_v43, %v717_v6 }
 0x1d2   :  { %1556 = vmatpush.bf16.msrb.mxu0 %v1503_v37  ;;  %v4568_v27 = vpop.f32.mrf.mxu2  ;;  %v2818_v37 = vld [vmem:[%s4946_s3 + $0x10] sm:$0xf] }
 0x1d3   :  { %v1420_v42 = vpop.f32.mrf.mxu3 }
 0x1d4   :  { %v4571_v2 = vadd.f32 %v1420_v42, %v1332_v54  ;;  %v4573_v3 = vpop.f32.mrf.mxu1 }
 0x1d6   :  { %1557 = vmatpush.bf16.msrb.mxu0 %v1502_v0 }
 0x1d8   :  { %v4575_v16 = vpop.f32.mrf.mxu0 }
 0x1da   :  { %1558 = vmatpush.bf16.msrb.mxu0 %v1501_v44  ;;  %v1336_v26 = vpop.f32.mrf.mxu2 }
 0x1db   :  { %v4578_v45 = vpop.f32.mrf.mxu3 }
 0x1dc   :  { %v1247_v29 = vpop.f32.mrf.mxu1 }
 0x1dd   :  { %v1248_v51 = vadd.f32 %v1247_v29, %v1159_v11 }
 0x1de   :  { %1559 = vmatpush.bf16.msrb.mxu0 %v1500_v14 }
 0x1df   :  { %v1337_v38 = vadd.f32 %v1336_v26, %v1248_v51 }
 0x1e0   :  { %v1163_v30 = vpop.f32.mrf.mxu0 }
 0x1e1   :  { %v1164_v34 = vadd.f32 %v1163_v30, %v727_v21 }
 0x1e2   :  { %1560 = vmatpush.bf16.msrb.mxu0 %v4456_v13  ;;  %v4581_v52 = vpop.f32.mrf.mxu2  ;;  %v3142_v13 = vld [vmem:[%s4946_s3 + $0x4] sm:$0xf0] }
 0x1e3   :  { %v1425_v49 = vpop.f32.mrf.mxu3  ;;  %v2811_v62 = vor.u32 %v3142_v13, %v2810_v10 }
 0x1e4   :  { %v4583_v15 = vadd.f32 %v1425_v49, %v1337_v38  ;;  %v4585_v25 = vpop.f32.mrf.mxu1 }
 0x1e6   :  { %1561 = vmatpush.bf16.msrb.mxu0 %v4418_v31 }
 0x1e8   :  { %v1165_v33 = vpop.f32.mrf.mxu0 }
 0x1e9   :  { %v1166_v32 = vadd.f32 %v1165_v33, %v4545_v17 }
 0x1ea   :  { %1562 = vmatpush.bf16.msrb.mxu0 %v4384_v50  ;;  %v1341_v53 = vpop.f32.mrf.mxu2 }
 0x1eb   :  { %v4595_v28 = vpop.f32.mrf.mxu3 }
 0x1ec   :  { %v1252_v24 = vpop.f32.mrf.mxu1 }
 0x1ed   :  { %v1253_v36 = vadd.f32 %v1252_v24, %v1164_v34 }
 0x1ee   :  { %1563 = vmatpush.bf16.msrb.mxu0 %v4353_v7  ;;  %v3144_v7 = vld [vmem:[%s4946_s3 + $0x14] sm:$0xf0] }
 0x1ef   :  { %v1342_v31 = vadd.f32 %v1341_v53, %v1253_v36  ;;  %v2819_v42 = vor.u32 %v3144_v7, %v2818_v37 }
 0x1f0   :  { %v1168_v23 = vpop.f32.mrf.mxu0 }
 0x1f1   :  { %1564 = vmatmul.bf16.vlgmr.msrb.gmra.mxu0 %v2811_v62  ;;  %v1169_v55 = vadd.f32 %v1168_v23, %v4531_v18 }
 0x1f2   :  { %v1343_v50 = vpop.f32.mrf.mxu2 }
 0x1f3   :  { %v1430_v39 = vpop.f32.mrf.mxu3 }
 0x1f4   :  { %v1431_v48 = vadd.f32 %v1430_v39, %v1342_v31  ;;  %v1254_v12 = vpop.f32.mrf.mxu1 }
 0x1f5   :  { %v1255_v41 = vadd.f32 %v1254_v12, %v1166_v32 }
 0x1f6   :  { %v1480_v20 = vmax.f32 %v1431_v48, 0.0 }
 0x1f7   :  { %v1344_v43 = vadd.f32 %v1343_v50, %v1255_v41 }
 0x1f8   :  { %v1170_v54 = vpop.f32.mrf.mxu0 }
 0x1f9   :  { %v1171_v6 = vadd.f32 %v1170_v54, %v4563_v61 }
 0x1fa   :  { %v1346_v63 = vpop.f32.mrf.mxu2 }
 0x1fb   :  { %v1432_v57 = vpop.f32.mrf.mxu3 }
 0x1fc   :  { %v1433_v22 = vadd.f32 %v1432_v57, %v1344_v43  ;;  %v1257_v59 = vpop.f32.mrf.mxu1 }
 0x1fd   :  { %v1258_v17 = vadd.f32 %v1257_v59, %v1169_v55 }
 0x1fe   :  { %v1481_v1 = vmax.f32 %v1433_v22, 0.0 }
 0x1ff   :  { %v1347_v0 = vadd.f32 %v1346_v63, %v1258_v17 }
 0x200   :  { %v1173_v4 = vpop.f32.mrf.mxu0  ;;  %v4606_v18 = vpack.c.bf16 %v1481_v1, %v1480_v20 }
 0x201   :  { %1569 = vmatmul.bf16.gmra.mxu0 %v2819_v42  ;;  %v1174_v51 = vadd.f32 %v1173_v4, %v4298_v60 }
 0x202   :  { %v1348_v5 = vpop.f32.mrf.mxu2 }
 0x203   :  { %v1435_v44 = vpop.f32.mrf.mxu3 }
 0x204   :  { %v1436_v11 = vadd.f32 %v1435_v44, %v1347_v0  ;;  %v1259_v9 = vpop.f32.mrf.mxu1 }
 0x205   :  { %v1260_v26 = vadd.f32 %v1259_v9, %v1171_v6 }
 0x206   :  { %v1482_v34 = vmax.f32 %v1436_v11, 0.0 }
 0x207   :  { %v1349_v29 = vadd.f32 %v1348_v5, %v1260_v26 }
 0x208   :  { %v1175_v14 = vpop.f32.mrf.mxu0 }
 0x20a   :  { %v1351_v38 = vpop.f32.mrf.mxu2 }
 0x20b   :  { %v1437_v30 = vpop.f32.mrf.mxu3 }
 0x20c   :  { %v1438_v49 = vadd.f32 %v1437_v30, %v1349_v29  ;;  %v1262_v21 = vpop.f32.mrf.mxu1 }
 0x20d   :  { %v1263_v33 = vadd.f32 %v1262_v21, %v1174_v51 }
 0x20e   :  { %v1483_v53 = vmax.f32 %v1438_v49, 0.0 }
 0x20f   :  { %v1352_v10 = vadd.f32 %v1351_v38, %v1263_v33 }
 0x210   :  { %v1178_v13 = vpop.f32.mrf.mxu0  ;;  %v4610_v24 = vpack.c.bf16 %v1483_v53, %v1482_v34 }
 0x211   :  { %v1179_v30 = vadd.f32 %v1178_v13, %v4258_v35 }
 0x212   :  { %v1353_v61 = vpop.f32.mrf.mxu2 }
 0x213   :  { %v1440_v36 = vpop.f32.mrf.mxu3 }
 0x214   :  { %v4612_v62 = vadd.f32 %v1440_v36, %v1352_v10  ;;  %v1264_v31 = vpop.f32.mrf.mxu1 }
 0x218   :  { %v1180_v23 = vpop.f32.mrf.mxu0 }
 0x219   :  { %v1181_v29 = vadd.f32 %v1180_v23, %v4280_v47 }
 0x21a   :  { %v1356_v50 = vpop.f32.mrf.mxu2 }
 0x21b   :  { %v1442_v39 = vpop.f32.mrf.mxu3 }
 0x21c   :  { %v1267_v60 = vpop.f32.mrf.mxu1 }
 0x21d   :  { %v1268_v53 = vadd.f32 %v1267_v60, %v1179_v30 }
 0x220   :  { %v1183_v48 = vpop.f32.mrf.mxu0 }
 0x221   :  { %v1184_v11 = vadd.f32 %v1183_v48, %v4296_v58 }
 0x222   :  { %v1358_v32 = vpop.f32.mrf.mxu2 }
 0x223   :  { %v1445_v12 = vpop.f32.mrf.mxu3 }
 0x224   :  { %v1269_v41 = vpop.f32.mrf.mxu1 }
 0x225   :  { %v1270_v21 = vadd.f32 %v1269_v41, %v1181_v29 }
 0x228   :  { %v1185_v43 = vpop.f32.mrf.mxu0 }
 0x229   :  { %v1186_v4 = vadd.f32 %v1185_v43, %v4222_v19  ;;  %v1176_v19 = vadd.f32 %v1175_v14, %v4509_v56  ;;  %v1359_v43 = vadd.f32 %v1358_v32, %v1270_v21 }
 0x22a   :  { %v1361_v54 = vpop.f32.mrf.mxu2 }
 0x22b   :  { %v1447_v55 = vpop.f32.mrf.mxu3  ;;  %v1265_v48 = vadd.f32 %v1264_v31, %v1176_v19 }
 0x22c   :  { %v1272_v63 = vpop.f32.mrf.mxu1 }
 0x22d   :  { %v1273_v51 = vadd.f32 %v1272_v63, %v1184_v11  ;;  %v1357_v63 = vadd.f32 %v1356_v50, %v1268_v53  ;;  %v1354_v41 = vadd.f32 %v1353_v61, %v1265_v48  ;;  %v712_v50 = vpop.permute.xlu1 %711  ;;  %v1484_v61 = vmax.f32 %v4612_v62, 0.0 }
 0x22f   :  { %v1362_v10 = vadd.f32 %v1361_v54, %v1273_v51  ;;  %v1443_v56 = vadd.f32 %v1442_v39, %v1354_v41  ;;  %v722_v54 = vpop.permute.xlu2 %721 }
 0x230   :  { %v1188_v22 = vpop.f32.mrf.mxu0  ;;  %v1161_v31 = vadd.f32 %v4575_v16, %v722_v54 }
 0x231   :  { %v1189_v1 = vadd.f32 %v1188_v22, %v4199_v8  ;;  %v1448_v22 = vadd.f32 %v1447_v55, %v1359_v43  ;;  %v1485_v32 = vmax.f32 %v1443_v56, 0.0 }
 0x232   :  { %v1363_v57 = vpop.f32.mrf.mxu2  ;;  %v1250_v55 = vadd.f32 %v4585_v25, %v1161_v31 }
 0x233   :  { %v1450_v37 = vpop.f32.mrf.mxu3  ;;  %v1487_v14 = vmax.f32 %v1448_v22, 0.0  ;;  %v1508_v39 = vpack.c.bf16 %v1485_v32, %v1484_v61  ;;  %v3147_v22 = vld [vmem:[%s4950_s7 + $0xc] sm:$0x10] }
 0x234   :  { %v1274_v7 = vpop.f32.mrf.mxu1 }
 0x235   :  { %v1275_v9 = vadd.f32 %v1274_v7, %v1186_v4  ;;  %v1451_v7 = vadd.f32 %v1450_v37, %v1362_v10 }
 0x237   :  { %v1364_v8 = vadd.f32 %v1363_v57, %v1275_v9  ;;  %v1446_v57 = vadd.f32 %v1445_v12, %v1357_v63  ;;  %v1156_v12 = vadd.f32 %v4555_v46, %v712_v50  ;;  %v1478_v46 = vmax.f32 %v4583_v15, 0.0  ;;  %v3143_v15 = vld [vmem:[%s4946_s3 + $0x14] sm:$0xf]  ;;  %v2827_v63 = vld [vmem:[%s4950_s7] sm:$0xf] }
 0x238   :  { %v1190_v20 = vpop.f32.mrf.mxu0  ;;  %v2851_v50 = vld [vmem:[%s4950_s7 + $0x20] sm:$0xf] }
 0x239   :  { %v1191_v5 = vadd.f32 %v1190_v20, %v4269_v40  ;;  %v1339_v20 = vadd.f32 %v4581_v52, %v1250_v55  ;;  %v3151_v55 = vld [vmem:[%s4950_s7 + $0x2c] sm:$0x10] }
 0x23a   :  { %v1366_v42 = vpop.f32.mrf.mxu2  ;;  %v2852_v61 = vor.u32 %v3151_v55, %v2851_v50 }
 0x23b   :  { %v1452_v59 = vpop.f32.mrf.mxu3  ;;  %v1428_v16 = vadd.f32 %v4595_v28, %v1339_v20  ;;  %v2820_v28 = vld [vmem:[%s4946_s3 + $0x18] sm:$0xf0]  ;;  %v3146_v20 = vld [vmem:[%s4950_s7 + $0xc] sm:$0xf] }
 0x23c   :  { %v1277_v17 = vpop.f32.mrf.mxu1  ;;  %v1453_v36 = vadd.f32 %v1452_v59, %v1364_v8  ;;  %v1486_v59 = vmax.f32 %v1446_v57, 0.0 }
 0x23d   :  { %v1278_v6 = vadd.f32 %v1277_v17, %v1189_v1  ;;  %v1488_v17 = vmax.f32 %v1451_v7, 0.0  ;;  %v1479_v62 = vmax.f32 %v1428_v16, 0.0 }
 0x23e   :  { %v1489_v35 = vmax.f32 %v1453_v36, 0.0  ;;  %v1509_v37 = vpack.c.bf16 %v1487_v14, %v1486_v59 }
 0x23f   :  { %v1367_v38 = vadd.f32 %v1366_v42, %v1278_v6  ;;  %v1245_v42 = vadd.f32 %v4573_v3, %v1156_v12  ;;  %v1505_v52 = vpack.c.bf16 %v1479_v62, %v1478_v46  ;;  %v3155_v62 = vld [vmem:[%s4950_s7 + $0x4c] sm:$0x10] }
 0x240   :  { %v1510_v60 = vpack.c.bf16 %v1489_v35, %v1488_v17  ;;  %v2828_v35 = vor.u32 %v3147_v22, %v2827_v63 }
 0x241   :  { %v1334_v1 = vadd.f32 %v4568_v27, %v1245_v42  ;;  %v3141_v27 = vld [vmem:[%s4946_s3 + $0x4] sm:$0xf]  ;;  %v2829_v42 = vld [vmem:[%s4950_s7 + $0x10] sm:$0x10] }
 0x242   :  { %v1368_v49 = vpop.f32.mrf.mxu2 }
 0x243   :  { %v1455_v0 = vpop.f32.mrf.mxu3  ;;  %v1423_v25 = vadd.f32 %v4578_v45, %v1334_v1  ;;  %v2812_v45 = vld [vmem:[%s4946_s3 + $0x8] sm:$0xf0]  ;;  %v2837_v1 = vld [vmem:[%s4950_s7 + $0x18] sm:$0x10] }
 0x244   :  { %v1279_v44 = vpop.f32.mrf.mxu1  ;;  %v1456_v33 = vadd.f32 %v1455_v0, %v1367_v38  ;;  %v1476_v0 = vmax.f32 %v4571_v2, 0.0  ;;  %v2815_v2 = vor.u32 %v3141_v27, %v2812_v45  ;;  %v1534_v38 = vpop.permute.xlu0 %1533  ;;  %v2840_v46 = vor.u32 %v3146_v20, %v2837_v1 }
 0x245   :  { %v1280_v26 = vadd.f32 %v1279_v44, %v1191_v5  ;;  %v1477_v3 = vmax.f32 %v1423_v25, 0.0  ;;  %v1529_v44 = vpop.permute.xlu2 %1528  ;;  %v2875_v25 = vld [vmem:[%s4950_s7 + $0x40] sm:$0xf] }
 0x246   :  { %v1490_v47 = vmax.f32 %v1456_v33, 0.0  ;;  %v1519_v33 = vpop.permute.xlu1 %1518 }
 0x247   :  { %v1369_v34 = vadd.f32 %v1368_v49, %v1280_v26 }
 0x24b   :  { %v1457_v40 = vpop.f32.mrf.mxu3 }
 0x24c   :  { %v1458_v58 = vadd.f32 %v1457_v40, %v1369_v34  ;;  %v1605_v56 = vpop.permute.xlu0 %1604 }
 0x24d   :  { %v1524_v29 = vpop.permute.xlu2 %1523 }
 0x24e   :  { %v1491_v23 = vmax.f32 %v1458_v58, 0.0 }
 0x250   :  { %v1511_v13 = vpack.c.bf16 %v1491_v23, %v1490_v47  ;;  %v1598_v23 = vld [vmem:[%s4948_s5] sm:$0x3]  ;;  %s3412_s5 = smov 119  }
 0x252   :  { %1575 = vmatpush.bf16.msrb.mxu1 %v1511_v13  ;;  %3201 = vmatpush.bf16.msrb.mxu2 %v1511_v13  ;;  %v3411_v13 = vmov 65535  }
 0x253   :  { %v1668_v41 = vsel %vm1666_vm2, 4294967295, %v3411_v13 }
 0x254   :  { %v4657_v57 = vsel %vm1667_vm3, %v1668_v41, 0  ;;  %v2883_v41 = vld [vmem:[%s4950_s7 + $0x48] sm:$0xf] }
 0x255   :  { %v1671_v17 = vand.u32 %v2828_v35, %v4657_v57  ;;  %v1770_v12 = vand.u32 %v2852_v61, %v4657_v57 }
 0x256   :  { %1576 = vmatpush.bf16.msrb.mxu1 %v1510_v60  ;;  %3202 = vmatpush.bf16.msrb.mxu2 %v1510_v60 }
 0x257   :  { %1689 = vmatpush.bf16.msrb.mxu3 %v1671_v17  ;;  %v3156_v17 = vld [vmem:[%s4950_s7 + $0x54] sm:$0x10] }
 0x25a   :  { %1577 = vmatpush.bf16.msrb.mxu1 %v1509_v37  ;;  %3203 = vmatpush.bf16.msrb.mxu2 %v1509_v37 }
 0x25e   :  { %1578 = vmatpush.bf16.msrb.mxu1 %v1508_v39  ;;  %3204 = vmatpush.bf16.msrb.mxu2 %v1508_v39  ;;  %v3145_v39 = vld [vmem:[%s4950_s7 + $0x4] sm:$0xf] }
 0x25f   :  { %v2832_v16 = vor.u32 %v3145_v39, %v2829_v42 }
 0x262   :  { %1579 = vmatpush.bf16.msrb.mxu1 %v4610_v24  ;;  %3205 = vmatpush.bf16.msrb.mxu2 %v4610_v24  ;;  %v2823_v24 = vor.u32 %v3143_v15, %v2820_v28 }
 0x266   :  { %1580 = vmatpush.bf16.msrb.mxu1 %v4606_v18  ;;  %3206 = vmatpush.bf16.msrb.mxu2 %v4606_v18  ;;  %v1504_v18 = vpack.c.bf16 %v1477_v3, %v1476_v0  ;;  %v2876_v3 = vor.u32 %v3155_v62, %v2875_v25  ;;  %v1680_v0 = vand.u32 %v2840_v46, %v4657_v57  ;;  %v3167_v62 = vld [vmem:[%s4952_s9 + $0x30] sm:$0xff]  ;;  %v3166_v46 = vld [vmem:[%s4952_s9 + $0x28] sm:$0xff] }
 0x268   :  { %v1869_v27 = vand.u32 %v2876_v3, %v4657_v57  ;;  %1728 = vmatpush.bf16.msra.mxu0 %v1680_v0  ;;  %v3165_v3 = vld [vmem:[%s4952_s9 + $0x20] sm:$0xff]  ;;  %v3164_v0 = vld [vmem:[%s4952_s9 + $0x18] sm:$0xff] }
 0x26a   :  { %1581 = vmatpush.bf16.msrb.mxu1 %v1505_v52  ;;  %3207 = vmatpush.bf16.msrb.mxu2 %v1505_v52  ;;  %v1674_v52 = vand.u32 %v2832_v16, %v4657_v57  ;;  %v3160_v16 = vld [vmem:[%s4950_s7 + $0x74] sm:$0x10] }
 0x26e   :  { %1582 = vmatpush.bf16.msrb.mxu1 %v1504_v18  ;;  %3208 = vmatpush.bf16.msrb.mxu2 %v1504_v18  ;;  %v1565_v4 = vpop.f32.mrf.mxu0  ;;  %v2835_v18 = vld [vmem:[%s4950_s7 + $0x8] sm:$0xf] }
 0x26f   :  { %v1566_v19 = vadd.f32 %v1565_v4, %v1519_v33  ;;  %v3152_v33 = vld [vmem:[%s4950_s7 + $0x34] sm:$0x10] }
 0x271   :  { %1583 = vmatmul.bf16.vlgmr.msrb.gmra.mxu1 %v2815_v2  ;;  %1588 = vmatmul.bf16.vlgmr.msrb.gmra.mxu2 %v2823_v24  ;;  %v3148_v2 = vld [vmem:[%s4950_s7 + $0x14] sm:$0x10]  ;;  %v3149_v24 = vld [vmem:[%s4950_s7 + $0x24] sm:$0xf] }
 0x272   :  { %1788 = vmatpush.bf16.msra.mxu1 %v1770_v12  ;;  %v2836_v4 = vor.u32 %v3148_v2, %v2835_v18  ;;  %v3192_v18 = vld [vmem:[%s4952_s9 + $0xf8] sm:$0xff]  ;;  %v3191_v2 = vld [vmem:[%s4952_s9 + $0xf0] sm:$0xff] }
 0x276   :  { %v1567_v5 = vpop.f32.mrf.mxu0  ;;  %1887 = vmatpush.bf16.msrb.mxu1 %v1869_v27  ;;  %v3163_v27 = vld [vmem:[%s4952_s9 + $0x10] sm:$0xff] }
 0x277   :  { %v1568_v49 = vadd.f32 %v1567_v5, %v1524_v29  ;;  %v2853_v5 = vld [vmem:[%s4950_s7 + $0x30] sm:$0x10]  ;;  %v3159_v29 = vld [vmem:[%s4950_s7 + $0x6c] sm:$0x10] }
 0x27e   :  { %v1570_v6 = vpop.f32.mrf.mxu0 }
 0x27f   :  { %v1571_v51 = vadd.f32 %v1570_v6, %v1529_v44  ;;  %v3150_v6 = vld [vmem:[%s4950_s7 + $0x2c] sm:$0xf]  ;;  %v2861_v44 = vld [vmem:[%s4950_s7 + $0x38] sm:$0x10] }
 0x286   :  { %v1572_v26 = vpop.f32.mrf.mxu0 }
 0x287   :  { %v1573_v21 = vadd.f32 %v1572_v26, %v1534_v38  ;;  %v2899_v26 = vld [vmem:[%s4950_s7 + $0x60] sm:$0xf] }
 0x288   :  { %v2900_v38 = vor.u32 %v3159_v29, %v2899_v26  ;;  %v3174_v29 = vld [vmem:[%s4952_s9 + $0x68] sm:$0xff] }
 0x2ee   :  { %v1584_v11 = vpop.f32.mrf.mxu1 }
 0x2ef   :  { %v1585_v10 = vadd.f32 %v1584_v11, %v1566_v19  ;;  %v2856_v11 = vor.u32 %v3149_v24, %v2853_v5  ;;  %v2877_v19 = vld [vmem:[%s4950_s7 + $0x50] sm:$0x10]  ;;  %v3176_v24 = vld [vmem:[%s4952_s9 + $0x78] sm:$0xff] }
 0x2f1   :  { %v1594_v7 = vmax.f32 %v1585_v10, 0.0 }
 0x2f4   :  { %v1589_v9 = vpop.f32.mrf.mxu2 }
 0x2f5   :  { %v1590_v8 = vadd.f32 %v1589_v9, %v1571_v51  ;;  %v2864_v9 = vor.u32 %v3150_v6, %v2861_v44  ;;  %v1677_v51 = vand.u32 %v2836_v4, %v4657_v57  ;;  %v3190_v4 = vld [vmem:[%s4952_s9 + $0xe8] sm:$0xff]  ;;  %v3175_v44 = vld [vmem:[%s4952_s9 + $0x70] sm:$0xff] }
 0x2f6   :  { %v1586_v30 = vpop.f32.mrf.mxu1 }
 0x2f7   :  { %v1587_v40 = vadd.f32 %v1586_v30, %v1568_v49  ;;  %v1596_v36 = vmax.f32 %v1590_v8, 0.0  ;;  %v1773_v30 = vand.u32 %v2856_v11, %v4657_v57  ;;  %v1779_v49 = vand.u32 %v2864_v9, %v4657_v57  ;;  %1715 = vmatpush.bf16.msra.mxu3 %v1677_v51  ;;  %v2859_v8 = vld [vmem:[%s4950_s7 + $0x28] sm:$0xf]  ;;  %v3189_v11 = vld [vmem:[%s4952_s9 + $0xe0] sm:$0xff] }
 0x2f8   :  { %v2860_v10 = vor.u32 %v3152_v33, %v2859_v8  ;;  %v4846_v9 = vld [vmem:[%s4951_s8] sm:$0xf]  ;;  %s2479_s8 = sshll.u32 %s4956_s13, 4  ;;  %s2480_s8 = int_to_ptr.hbm [resolvable:$true] %s2479_s8 }
 0x2f9   :  { %v1595_v48 = vmax.f32 %v1587_v40, 0.0  ;;  %1827 = vmatpush.bf16.msrb.mxu0 %v1779_v49  ;;  %v3154_v40 = vld [vmem:[%s4950_s7 + $0x4c] sm:$0xf]  ;;  %v1627_v26 = vperm.slane %v4846_v9, 0  ;;  %v3173_v33 = vld [vmem:[%s4952_s9 + $0x60] sm:$0xff] }
 0x2fa   :  { %v1776_v22 = vand.u32 %v2860_v10, %v4657_v57 }
 0x2fb   :  { %v1599_v47 = vpack.c.bf16 %v1595_v48, %v1594_v7 }
 0x2fc   :  { %v1591_v34 = vpop.f32.mrf.mxu2 }
 0x2fd   :  { %v1592_v53 = vadd.f32 %v1591_v34, %v1573_v21  ;;  %v1968_v21 = vand.u32 %v2900_v38, %v4657_v57  ;;  %v3153_v34 = vld [vmem:[%s4950_s7 + $0x44] sm:$0xf] }
 0x2ff   :  { %v1597_v58 = vmax.f32 %v1592_v53, 0.0  ;;  %v2885_v53 = vld [vmem:[%s4950_s7 + $0x58] sm:$0x10] }
 0x301   :  { %v1600_v43 = vpack.c.bf16 %v1597_v58, %v1596_v36  ;;  %v2880_v36 = vor.u32 %v3153_v34, %v2877_v19  ;;  %v2888_v58 = vor.u32 %v3154_v40, %v2885_v53  ;;  %v3187_v34 = vld [vmem:[%s4952_s9 + $0xd0] sm:$0xff]  ;;  %v3172_v40 = vld [vmem:[%s4952_s9 + $0x58] sm:$0xff] }
 0x302   :  { %v3184_v53 = vld [vmem:[%s4952_s9 + $0xb8] sm:$0xff] }
 0x303   :  { %1617 = vmatpush.bf16.msra.mxu2 %v1600_v43  ;;  %v1872_v35 = vand.u32 %v2880_v36, %v4657_v57  ;;  %v1878_v13 = vand.u32 %v2888_v58, %v4657_v57  ;;  %v3186_v58 = vld [vmem:[%s4952_s9 + $0xc8] sm:$0xff] }
 0x307   :  { %1618 = vmatpush.bf16.msra.mxu2 %v1599_v47 }
 0x30a   :  { %2824 = vmatmul.msk.bf16.vlgmr.msra.gmra.mxu2 %vm1607_vm1, %v1598_v23 }
 0x30b   :  { %1702 = vmatpush.bf16.msrb.mxu2 %v1674_v52 }
 0x30f   :  { %1801 = vmatpush.bf16.msra.mxu2 %v1773_v30  ;;  %v3188_v30 = vld [vmem:[%s4952_s9 + $0xd8] sm:$0xff] }
 0x38d   :  { %v1620_v14 = vpop.f32.mrf.mxu2 }
 0x38e   :  { %v1621_v60 = vadd.f32 %v1620_v14, %v1605_v56  ;;  %v3157_v56 = vld [vmem:[%s4950_s7 + $0x64] sm:$0xf]  ;;  %v2901_v14 = vld [vmem:[%s4950_s7 + $0x70] sm:$0x10] }
 0x38f   :  { %v2904_v50 = vor.u32 %v3157_v56, %v2901_v14 }
 0x390   :  { %v4660_v54 = vmax.f32 %v1621_v60, 0.0  ;;  %v3158_v60 = vld [vmem:[%s4950_s7 + $0x6c] sm:$0xf] }
 0x391   :  { %v1971_v39 = vand.u32 %v2904_v50, %v4657_v57 }
 0x392   :  { %1740 = vrot.lane.b32.xlu2 %v4660_v54, %s3412_s5  ;;  %v1738_v59 = vrot.slane %v4660_v54, 1  ;;  %v1636_v31 = vrot.slane %v4660_v54, 7  ;;  %v1837_v37 = vrot.slane %v4660_v54, 2 }
 0x394   :  { %1839 = vrot.lane.b32.xlu0 %v1738_v59, %s3412_s5  ;;  %1637 = vrot.lane.b32.xlu1 %v1636_v31, %s3412_s5 }
 0x395   :  { %v1622_v32 = vpop.f32.mrf.mxu2 }
 0x396   :  { %v1936_v32 = vrot.slane %v4660_v54, 3 }
 0x39c   :  { %1938 = vrot.lane.b32.xlu1 %v1837_v37, %s3412_s5 }
 0x3ec   :  { %v1741_v45 = vpop.permute.xlu2 %1740 }
 0x3ed   :  { %v1743_v15 = vsel %vm1640_vm4, %v1738_v59, %v1741_v45  ;;  %v2909_v59 = vld [vmem:[%s4950_s7 + $0x78] sm:$0x10] }
 0x3ee   :  { %v4695_v28 = vpack.c.bf16 %v1743_v15, %v1743_v15  ;;  %v2912_v55 = vor.u32 %v3158_v60, %v2909_v59  ;;  %v3162_v15 = vld [vmem:[%s4952_s9 + $0x8] sm:$0xff] }
 0x3f0   :  { %2865 = vmatmul.msk.bf16.vlgmr.msra.gmra.mxu1 %vm431_vm0, %v4695_v28  ;;  %v1977_v20 = vand.u32 %v2912_v55, %v4657_v57 }
 0x3f1   :  { %1986 = vmatpush.bf16.msra.mxu1 %v1968_v21 }
 0x406   :  { %v1840_v48 = vpop.permute.xlu0 %1839  ;;  %v1638_v43 = vpop.permute.xlu1 %1637 }
 0x407   :  { %v1842_v7 = vsel %vm1640_vm4, %v1837_v37, %v1840_v48  ;;  %v1641_v47 = vsel %vm1640_vm4, %v4660_v54, %v1638_v43  ;;  %v2884_v37 = vor.u32 %v3156_v17, %v2883_v41  ;;  %v2907_v54 = vld [vmem:[%s4950_s7 + $0x68] sm:$0xf] }
 0x408   :  { %v1843_v23 = vpack.c.bf16 %v1842_v7, %v1842_v7  ;;  %v1642_v63 = vpack.c.bf16 %v1641_v47, %v1641_v47  ;;  %v2908_v1 = vor.u32 %v3160_v16, %v2907_v54  ;;  %v3171_v47 = vld [vmem:[%s4952_s9 + $0x50] sm:$0xff]  ;;  %v3182_v41 = vld [vmem:[%s4952_s9 + $0xa8] sm:$0xff]  ;;  %v1630_v54 = vperm.slane %v4846_v9, 3 }
 0x409   :  { %v1875_v12 = vand.u32 %v2884_v37, %v4657_v57  ;;  %v3180_v37 = vld [vmem:[%s4952_s9 + $0x98] sm:$0xff] }
 0x40a   :  { %2841 = vmatmul.msk.bf16.vlgmr.msrb.gmra.mxu3 %vm431_vm0, %v1642_v63  ;;  %2842 = vmatmul.msk.bf16.vlgmr.msrb.gmra.mxu2 %vm431_vm0, %v1642_v63  ;;  %v1974_v25 = vand.u32 %v2908_v1, %v4657_v57  ;;  %v3168_v57 = vld [vmem:[%s4952_s9 + $0x38] sm:$0xff]  ;;  %v3177_v1 = vld [vmem:[%s4952_s9 + $0x80] sm:$0xff] }
 0x40b   :  { %2844 = vmatmul.msk.bf16.vlgmr.msra.gmra.mxu0 %vm431_vm0, %v1642_v63  ;;  %2889 = vmatmul.msk.bf16.vlgmr.msrb.gmra.mxu1 %vm431_vm0, %v1843_v23 }
 0x40c   :  { %1814 = vmatpush.bf16.msrb.mxu3 %v1776_v22  ;;  %1900 = vmatpush.bf16.msrb.mxu2 %v1872_v35  ;;  %v3185_v22 = vld [vmem:[%s4952_s9 + $0xc0] sm:$0xff] }
 0x40d   :  { %1926 = vmatpush.bf16.msra.mxu0 %v1878_v13  ;;  %2303 = vmatpush.bf16.msrb.mxu1 %v3168_v57  ;;  %v3170_v13 = vld [vmem:[%s4952_s9 + $0x48] sm:$0xff]  ;;  %v1628_v57 = vperm.slane %v4846_v9, 1 }
 0x40e   :  { %v1939_v31 = vpop.permute.xlu1 %1938 }
 0x40f   :  { %v1941_v61 = vsel %vm1640_vm4, %v1936_v32, %v1939_v31  ;;  %v3169_v31 = vld [vmem:[%s4952_s9 + $0x40] sm:$0xff] }
 0x410   :  { %v1942_v42 = vpack.c.bf16 %v1941_v61, %v1941_v61  ;;  %v3181_v32 = vld [vmem:[%s4952_s9 + $0xa0] sm:$0xff]  ;;  %v3179_v61 = vld [vmem:[%s4952_s9 + $0x90] sm:$0xff] }
 0x411   :  { %2304 = vmatpush.bf16.msrb.mxu1 %v3167_v62 }
 0x415   :  { %2305 = vmatpush.bf16.msrb.mxu1 %v3166_v46 }
 0x419   :  { %2306 = vmatpush.bf16.msrb.mxu1 %v3165_v3 }
 0x41a   :  { %2843 = vmatmul.msk.bf16.vlgmr.msra.gmra.mxu3 %vm431_vm0, %v1642_v63  ;;  %2866 = vmatmul.msk.bf16.vlgmr.msra.gmra.mxu2 %vm431_vm0, %v4695_v28 }
 0x41b   :  { %2868 = vmatmul.msk.bf16.vlgmr.msrb.gmra.mxu0 %vm431_vm0, %v4695_v28  ;;  %2913 = vmatmul.msk.bf16.vlgmr.msra.gmra.mxu1 %vm431_vm0, %v1942_v42 }
 0x41c   :  { %1913 = vmatpush.bf16.msra.mxu3 %v1875_v12  ;;  %1999 = vmatpush.bf16.msra.mxu2 %v1971_v39  ;;  %v3178_v39 = vld [vmem:[%s4952_s9 + $0x88] sm:$0xff] }
 0x41d   :  { %2025 = vmatpush.bf16.msrb.mxu0 %v1977_v20  ;;  %2307 = vmatpush.bf16.msrb.mxu1 %v3164_v0 }
 0x421   :  { %2308 = vmatpush.bf16.msrb.mxu1 %v3163_v27 }
 0x425   :  { %2309 = vmatpush.bf16.msrb.mxu1 %v3162_v15 }
 0x42a   :  { %2867 = vmatmul.msk.bf16.vlgmr.msrb.gmra.mxu3 %vm431_vm0, %v4695_v28  ;;  %2890 = vmatmul.msk.bf16.vlgmr.msrb.gmra.mxu2 %vm431_vm0, %v1843_v23  ;;  %v3161_v28 = vld [vmem:[%s4952_s9] sm:$0xff] }
 0x42b   :  { %2892 = vmatmul.msk.bf16.vlgmr.msra.gmra.mxu0 %vm431_vm0, %v1843_v23  ;;  %2012 = vmatpush.bf16.msrb.mxu3 %v1974_v25 }
 0x42c   :  { %2310 = vmatpush.bf16.msrb.mxu1 %v3161_v28  ;;  %2342 = vmatpush.bf16.msra.mxu0 %v3192_v18 }
 0x42d   :  { %2316 = vmatpush.bf16.msrb.mxu2 %v3176_v24 }
 0x430   :  { %2343 = vmatpush.bf16.msra.mxu0 %v3191_v2 }
 0x431   :  { %2317 = vmatpush.bf16.msrb.mxu2 %v3175_v44 }
 0x434   :  { %2344 = vmatpush.bf16.msra.mxu0 %v3190_v4 }
 0x435   :  { %2318 = vmatpush.bf16.msrb.mxu2 %v3174_v29 }
 0x438   :  { %2345 = vmatpush.bf16.msra.mxu0 %v3189_v11 }
 0x439   :  { %2319 = vmatpush.bf16.msrb.mxu2 %v3173_v33 }
 0x43a   :  { %2891 = vmatmul.msk.bf16.vlgmr.msra.gmra.mxu3 %vm431_vm0, %v1843_v23  ;;  %2914 = vmatmul.msk.bf16.vlgmr.msra.gmra.mxu2 %vm431_vm0, %v1942_v42  ;;  %v3183_v23 = vld [vmem:[%s4952_s9 + $0xb0] sm:$0xff] }
 0x43b   :  { %2916 = vmatmul.msk.bf16.vlgmr.msrb.gmra.mxu0 %vm431_vm0, %v1942_v42  ;;  %2329 = vmatpush.bf16.msra.mxu3 %v3184_v53  ;;  %v3200_v53 = vld [vmem:[%s4954_s11 + $0x38] sm:$0xff] }
 0x43c   :  { %2346 = vmatpush.bf16.msra.mxu0 %v3188_v30  ;;  %2425 = vmatpush.bf16.msra.mxu1 %v3200_v53 }
 0x43d   :  { %2320 = vmatpush.bf16.msrb.mxu2 %v3172_v40 }
 0x43f   :  { %2330 = vmatpush.bf16.msra.mxu3 %v3183_v23  ;;  %v3193_v23 = vld [vmem:[%s4954_s11] sm:$0xff] }
 0x440   :  { %2347 = vmatpush.bf16.msra.mxu0 %v3187_v34 }
 0x441   :  { %2321 = vmatpush.bf16.msrb.mxu2 %v3171_v47 }
 0x443   :  { %2331 = vmatpush.bf16.msra.mxu3 %v3182_v41 }
 0x444   :  { %2348 = vmatpush.bf16.msra.mxu0 %v3186_v58  ;;  %v3197_v58 = vld [vmem:[%s4954_s11 + $0x20] sm:$0xff] }
 0x445   :  { %2322 = vmatpush.bf16.msrb.mxu2 %v3170_v13  ;;  %v3377_v13 = vld [vmem:[%s4953_s10] ss:$0 sm:$0xff]  ;;  %s3413_s10 = smov [#allocation2]  }
 0x447   :  { %2332 = vmatpush.bf16.msra.mxu3 %v3181_v32 }
 0x448   :  { %2349 = vmatpush.bf16.msra.mxu0 %v3185_v22 }
 0x449   :  { %2323 = vmatpush.bf16.msrb.mxu2 %v3169_v31 }
 0x44a   :  { %2915 = vmatmul.msk.bf16.vlgmr.msrb.gmra.mxu3 %vm431_vm0, %v1942_v42 }
 0x44b   :  { %2333 = vmatpush.bf16.msra.mxu3 %v3180_v37  ;;  %v3378_v37 = vld [vmem:[%s4955_s12] ss:$0 sm:$0xff] }
 0x44f   :  { %2334 = vmatpush.bf16.msra.mxu3 %v3179_v61 }
 0x453   :  { %2335 = vmatpush.bf16.msra.mxu3 %v3178_v39 }
 0x457   :  { %2336 = vmatpush.bf16.msra.mxu3 %v3177_v1 }
 0x46d   :  { %v1790_v52 = vpop.f32.mrf.mxu1 }
 0x475   :  { %v1792_v45 = vpop.f32.mrf.mxu1 }
 0x488   :  { %v4835_v5 = vpop.f32.mrf.mxu0  ;;  %v1889_v6 = vpop.f32.mrf.mxu1 }
 0x489   :  { %v1737_v25 = vadd.f32 %v4835_v5, %v1630_v54 }
 0x48d   :  { %v1691_v51 = vpop.f32.mrf.mxu3  ;;  %v4852_v38 = vpop.f32.mrf.mxu2 }
 0x48e   :  { %v1734_v49 = vadd.f32 %v1691_v51, %v1627_v26  ;;  %v1735_v0 = vadd.f32 %v4852_v38, %v1628_v57  ;;  %v1629_v26 = vperm.slane %v4846_v9, 2  ;;  %v3199_v9 = vld [vmem:[%s4954_s11 + $0x30] sm:$0xff] }
 0x48f   :  { %2426 = vmatpush.bf16.msra.mxu1 %v3199_v9 }
 0x490   :  { %v1732_v21 = vpop.f32.mrf.mxu0  ;;  %v1891_v8 = vpop.f32.mrf.mxu1  ;;  %v1833_v19 = vadd.f32 %v1790_v52, %v1734_v49 }
 0x492   :  { %v1932_v48 = vadd.f32 %v1889_v6, %v1833_v19 }
 0x495   :  { %v1693_v10 = vpop.f32.mrf.mxu3  ;;  %v1706_v36 = vpop.f32.mrf.mxu2 }
 0x496   :  { %v3198_v36 = vld [vmem:[%s4954_s11 + $0x28] sm:$0xff] }
 0x497   :  { %2427 = vmatpush.bf16.msra.mxu1 %v3198_v36 }
 0x498   :  { %v1829_v43 = vpop.f32.mrf.mxu0  ;;  %v1988_v7 = vpop.f32.mrf.mxu1 }
 0x499   :  { %v2031_v63 = vadd.f32 %v1988_v7, %v1932_v48  ;;  %v1836_v62 = vadd.f32 %v1829_v43, %v1737_v25  ;;  %v3196_v48 = vld [vmem:[%s4954_s11 + $0x18] sm:$0xff]  ;;  %v3195_v43 = vld [vmem:[%s4954_s11 + $0x10] sm:$0xff]  ;;  %v3194_v7 = vld [vmem:[%s4954_s11 + $0x8] sm:$0xff]  ;;  %s2477_s11 = sshll.u32 %s3413_s10, 4  ;;  %s2478_s11 = int_to_ptr.vmem [resolvable:$true] %s2477_s11 }
 0x49b   :  { %v2035_v35 = vmax.f32 %v2031_v63, 0.0  ;;  %2428 = vmatpush.bf16.msra.mxu1 %v3197_v58 }
 0x49d   :  { %v2039_v17 = vpack.c.bf16 %v2035_v35, %v2035_v35  ;;  %v1717_v56 = vpop.f32.mrf.mxu3  ;;  %v1803_v14 = vpop.f32.mrf.mxu2 }
 0x49e   :  { %v1834_v15 = vadd.f32 %v1803_v14, %v1735_v0  ;;  %v1736_v30 = vadd.f32 %v1717_v56, %v1629_v26 }
 0x49f   :  { %2311 = vmatmul.bf16.vlgmr.msrb.gmra.mxu1 %v2039_v17 }
 0x4a0   :  { %v1831_v60 = vpop.f32.mrf.mxu0  ;;  %v1990_v59 = vpop.f32.mrf.mxu1  ;;  %2429 = vmatpush.bf16.msra.mxu1 %v3196_v48 }
 0x4a4   :  { %2430 = vmatpush.bf16.msra.mxu1 %v3195_v43 }
 0x4a5   :  { %v1719_v50 = vpop.f32.mrf.mxu3  ;;  %v1805_v55 = vpop.f32.mrf.mxu2 }
 0x4a8   :  { %v1928_v12 = vpop.f32.mrf.mxu0  ;;  %2431 = vmatpush.bf16.msra.mxu1 %v3194_v7 }
 0x4a9   :  { %v1935_v52 = vadd.f32 %v1928_v12, %v1836_v62 }
 0x4ac   :  { %2432 = vmatpush.bf16.msra.mxu1 %v3193_v23 }
 0x4ad   :  { %v1816_v42 = vpop.f32.mrf.mxu3  ;;  %v1902_v20 = vpop.f32.mrf.mxu2 }
 0x4ae   :  { %v1933_v18 = vadd.f32 %v1902_v20, %v1834_v15  ;;  %v1835_v38 = vadd.f32 %v1816_v42, %v1736_v30 }
 0x4b0   :  { %v1930_v16 = vpop.f32.mrf.mxu0 }
 0x4b5   :  { %v1818_v46 = vpop.f32.mrf.mxu3  ;;  %v1904_v3 = vpop.f32.mrf.mxu2 }
 0x4b8   :  { %v2027_v27 = vpop.f32.mrf.mxu0 }
 0x4b9   :  { %v2034_v45 = vadd.f32 %v2027_v27, %v1935_v52 }
 0x4bb   :  { %v2038_v28 = vmax.f32 %v2034_v45, 0.0 }
 0x4bd   :  { %v2042_v2 = vpack.c.bf16 %v2038_v28, %v2038_v28  ;;  %v1915_v24 = vpop.f32.mrf.mxu3  ;;  %v2001_v4 = vpop.f32.mrf.mxu2 }
 0x4be   :  { %v2032_v6 = vadd.f32 %v2001_v4, %v1933_v18  ;;  %v1934_v49 = vadd.f32 %v1915_v24, %v1835_v38 }
 0x4bf   :  { %2350 = vmatmul.bf16.vlgmr.msra.gmra.mxu0 %v2042_v2 }
 0x4c0   :  { %v2036_v44 = vmax.f32 %v2032_v6, 0.0  ;;  %v2029_v5 = vpop.f32.mrf.mxu0 }
 0x4c2   :  { %v2040_v11 = vpack.c.bf16 %v2036_v44, %v2036_v44 }
 0x4c4   :  { %2324 = vmatmul.bf16.vlgmr.msrb.gmra.mxu2 %v2040_v11 }
 0x4c5   :  { %v1917_v29 = vpop.f32.mrf.mxu3  ;;  %v2003_v51 = vpop.f32.mrf.mxu2 }
 0x4cd   :  { %v2014_v21 = vpop.f32.mrf.mxu3 }
 0x4ce   :  { %v2033_v8 = vadd.f32 %v2014_v21, %v1934_v49 }
 0x4d0   :  { %v2037_v33 = vmax.f32 %v2033_v8, 0.0 }
 0x4d2   :  { %v2041_v34 = vpack.c.bf16 %v2037_v33, %v2037_v33 }
 0x4d4   :  { %2337 = vmatmul.bf16.vlgmr.msra.gmra.mxu3 %v2041_v34 }
 0x4d5   :  { %v2016_v19 = vpop.f32.mrf.mxu3 }
 0x51c   :  { %v2312_v40 = vpop.f32.mrf.mxu1 }
 0x51d   :  { %v2313_v41 = vadd.f32 %v3377_v13, %v2312_v40 }
 0x524   :  { %v2314_v10 = vpop.f32.mrf.mxu1 }
 0x53c   :  { %v2351_v47 = vpop.f32.mrf.mxu0 }
 0x544   :  { %v2353_v63 = vpop.f32.mrf.mxu0 }
 0x547   :  { %v2325_v22 = vpop.f32.mrf.mxu2 }
 0x548   :  { %v2326_v17 = vadd.f32 %v2325_v22, %v2313_v41 }
 0x54f   :  { %v2327_v35 = vpop.f32.mrf.mxu2 }
 0x557   :  { %v2338_v56 = vpop.f32.mrf.mxu3 }
 0x558   :  { %v2339_v14 = vadd.f32 %v2338_v56, %v2326_v17 }
 0x55a   :  { %v2352_v60 = vadd.f32 %v2351_v47, %v2339_v14 }
 0x55c   :  { %v2355_v59 = vmax.f32 %v2352_v60, 0.0 }
 0x55e   :  { %v2356_v31 = vpack.c.bf16 %v2355_v59, %v2355_v59 }
 0x55f   :  { %v2340_v32 = vpop.f32.mrf.mxu3 }
 0x560   :  { %2433 = vmatmul.bf16.vlgmr.msra.gmra.mxu1 %v2356_v31 }
 0x5dd   :  { %v2434_v50 = vpop.f32.mrf.mxu1 }
 0x5de   :  { %v2435_v55 = vadd.f32 %v3378_v37, %v2434_v50 }
 0x5e0   :  { %v2438_v61 = vand.u32 2147483647, %v2435_v55  ;;  %vm2442_vm10 = vcmp.ge.f32.partialorder %v2435_v55, 0.0 }
 0x5e2   :  { %v2439_v12 = vsub.f32 0.0, %v2438_v61 }
 0x5e4   :  { %v2440_v39 = vmul.f32 1.442695, %v2439_v12 }
 0x5e5   :  { %v2436_v42 = vpop.f32.mrf.mxu1 }
 0x5e6   :  { %3379 = vpow2.f32 %v2440_v39 }
 0x5ec   :  { %v3380_v20 = vpop.eup %3379 }
 0x5ed   :  { %v2443_v54 = vadd.f32 1.0, %v3380_v20 }
 0x5ef   :  { %3381 = vrcp.f32 %v2443_v54  ;;  %v2455_v57 = vand.u32 2147483648, %v2443_v54  ;;  %v2453_v46 = vand.u32 2147483647, %v2443_v54  ;;  %vm2449_vm6 = vweird.f32 %v2443_v54 }
 0x5f1   :  { %v2456_v52 = vor.u32 1.1754944e-38, %v2455_v57  ;;  %vm2454_vm8 = vcmp.eq.f32.partialorder %v2453_v46, 8.507059e+37 }
 0x5f5   :  { %v3382_v16 = vpop.eup %3381 }
 0x5f6   :  { %v2445_v1 = vmul.f32 %v3382_v16, %v2443_v54  ;;  %vm2450_vm5 = vweird.f32 %v3382_v16 }
 0x5f7   :  { %vm2451_vm7 = vmor %vm2449_vm6, %vm2450_vm5 }
 0x5f8   :  { %v2446_v25 = vsub.f32 1.0, %v2445_v1 }
 0x5fa   :  { %v2447_v62 = vmul.f32 %v3382_v16, %v2446_v25 }
 0x5fc   :  { %v2448_v3 = vadd.f32 %v3382_v16, %v2447_v62 }
 0x5fe   :  { %v2452_v0 = vsel %vm2451_vm7, %v3382_v16, %v2448_v3 }
 0x5ff   :  { %v2457_v27 = vsel %vm2454_vm8, %v2456_v52, %v2452_v0 }
 0x600   :  { %v2459_v45 = vmul.f32 %v3380_v20, %v2457_v27 }
 0x602   :  { %v2460_v15 = vsel %vm2442_vm10, %v2457_v27, %v2459_v45 }
 0x603   :  { %v2462_v28 = vsel %vm2461_vm9, %v2460_v15, 0.0 }
 0x604   :  { %v2463_v18 = vrot.slane %v2462_v28, 4 }
 0x606   :  { %v2464_v2 = vadd.f32 %v2463_v18, %v2462_v28 }
 0x608   :  { %v2465_v24 = vrot.slane %v2464_v2, 2 }
 0x60a   :  { %v2466_v4 = vadd.f32 %v2465_v24, %v2464_v2 }
 0x60c   :  { %v2467_v6 = vrot.slane %v2466_v4, 1 }
 0x60e   :  { %v2468_v44 = vadd.f32 %v2467_v6, %v2466_v4 }
 0x610   :  { %v2469_v5 = vmul.f32 0.5, %v2468_v44 }
 0x612   :  { %2471 = vst.msk [vmem:[#allocation2] sm:$0x1] %vm2470_vm11, %v2469_v5 }
 0x613   :  { %2482 = dma.vmem_to_hbm [thread:$0]  %s2478_s11, 16, %s2480_s8, [#allocation3]  }
 0x614   :  { %3407 = dma.done.wait [#allocation3], 16  }
 0x615   :  { %3408 = vsyncadd [#allocation3], 4294967280 }
 0x616   :  { %2487 = vsyncpa [#allocation3], 1 }

</bundles_post_ra>
